<compile_context>
chip_gen: v5e
topology: v5e:2x2
jax: 0.10.0
libtpu: 0.0.40
codegen_flags: <defaults>
</compile_context>

<pallas_src>
import jax
import jax.numpy as jnp
from jax.experimental import pallas as pl
from jax.experimental.pallas import tpu as pltpu

# ---- synthetic "plant" sizes (small multibody system) ----
N_Q = 7            # n_q configuration dim
N_V = 6            # n_v velocity dim
N_U = 2            # n_u actuation dim
N_BODIES = 2
N_THETA = 10       # theta-format inertial parameters per body
N_I = N_BODIES * N_THETA
K_BASIS = 32       # number of SPD basis terms for M(q)
NV2 = N_V * N_V
EPS = 1e-2

N_FEAT = 2 * N_Q + N_V + N_U       # 22 : [sin q ; cos q ; v ; u]
N_ZF = K_BASIS + N_V               # 38 : fused [z ; f] output rows
N_OUT = NV2 + N_V                  # 42 : fused [M rows ; acc rows] output

B = 64             # batch (lives on the 128-lane axis inside the kernel)


def _softplus(z):
    # numerically stable softplus (no overflow for large z)
    return jnp.maximum(z, 0.0) + jnp.log1p(jnp.exp(-jnp.abs(z)))


def lagrangian_kernel(x_ref, w_ref, b_ref, obt_ref, reg_ref, out_ref):
    # Feature-major layout: rows = features / DOFs, lanes = batch.
    x = x_ref[...]                                               # (N_FEAT, B)
    row = jax.lax.broadcasted_iota(jnp.int32, x.shape, 0)
    feat = jnp.where(row < N_Q, jnp.sin(x),
                     jnp.where(row < 2 * N_Q, jnp.cos(x), x))    # [sin q; cos q; v; u]

    # ---- single fused matmul: mass-matrix basis logits z AND forces f ----
    zf = (jnp.dot(w_ref[...], feat, preferred_element_type=jnp.float32)
          + b_ref[...])                                          # (K+N_V, B)
    z = zf[:K_BASIS, :]                                          # (K, B)
    f = zf[K_BASIS:, :]                                          # (N_V, B)

    # ---- mass matrix M(q, inertia): positive basis weights -> SPD matrices ----
    d = _softplus(z)                                             # > 0
    m_flat = (jnp.dot(obt_ref[...], d, preferred_element_type=jnp.float32)
              + reg_ref[...])                                    # (NV2, B) row-major (i,j)

    def ent(i, j):
        c = i * N_V + j
        return m_flat[c:c + 1, :]                                # (1, B) sublane row

    # ---- batched solve M x = F via fully unrolled Cholesky (M is SPD) ----
    # rsqrt pivots (EUP) instead of f32 divides on the serial dependence chain.
    L = [[None] * N_V for _ in range(N_V)]
    rinv = [None] * N_V
    for i in range(N_V):
        for j in range(i + 1):
            s = ent(i, j)
            for p in range(j):
                s = s - L[i][p] * L[j][p]
            if i == j:
                r = jax.lax.rsqrt(s)
                rinv[i] = r
                L[i][i] = s * r                                  # sqrt(s)
            else:
                L[i][j] = s * rinv[j]

    y = [None] * N_V                                             # L y = F
    for i in range(N_V):
        s = f[i:i + 1, :]
        for p in range(i):
            s = s - L[i][p] * y[p]
        y[i] = s * rinv[i]

    x_sol = [None] * N_V                                         # L^T x = y
    for i in reversed(range(N_V)):
        s = y[i]
        for p in range(i + 1, N_V):
            s = s - L[p][i] * x_sol[p]
        x_sol[i] = s * rinv[i]

    # Single combined store: [M rows ; acc rows] -> (NV2 + N_V, B).
    out_ref[...] = jnp.concatenate([m_flat] + x_sol, axis=0)


def theta_to_inertia_vector(theta):
    # TODO(synk): exact dair_pll InertialParameterConverter theta->pi_cm->Drake
    # spatial-inertia conversion is replaced by a smooth deterministic surrogate.
    mass = jnp.exp(theta[:, :1])
    p = theta[:, 1:4]
    moments = jnp.exp(theta[:, 4:7])
    products = theta[:, 7:10]
    pi = jnp.concatenate([mass, mass * p, moments, products], axis=-1)
    return pi.reshape(1, -1)                                     # (1, N_I)


def init_params(key):
    ks = jax.random.split(key, 10)
    scale = 0.3
    theta = 0.1 * jax.random.normal(ks[0], (N_BODIES, N_THETA), jnp.float32)
    wd_s = scale * jax.random.normal(ks[1], (N_Q, K_BASIS), jnp.float32)
    wd_c = scale * jax.random.normal(ks[2], (N_Q, K_BASIS), jnp.float32)
    wd_i = scale * jax.random.normal(ks[3], (N_I, K_BASIS), jnp.float32)
    # SPD basis: row k is flatten(e_k e_k^T).
    e = jax.random.normal(ks[4], (K_BASIS, N_V), jnp.float32) / jnp.sqrt(N_V)
    o_flat = (e[:, :, None] * e[:, None, :]).reshape(K_BASIS, NV2)
    reg_row = (EPS * jnp.eye(N_V, dtype=jnp.float32)).reshape(1, NV2)
    v_s = scale * jax.random.normal(ks[5], (N_Q, N_V), jnp.float32)
    v_c = scale * jax.random.normal(ks[6], (N_Q, N_V), jnp.float32)
    v_v = scale * jax.random.normal(ks[7], (N_V, N_V), jnp.float32)
    v_u = scale * jax.random.normal(ks[8], (N_U, N_V), jnp.float32)
    v_i = scale * jax.random.normal(ks[9], (N_I, N_V), jnp.float32)
    return dict(theta=theta, wd_s=wd_s, wd_c=wd_c, wd_i=wd_i, o_flat=o_flat,
                reg_row=reg_row, v_s=v_s, v_c=v_c, v_v=v_v, v_u=v_u, v_i=v_i)


def lagrangian_terms_forward(q, v, u, params):
    """Returns (M, non_contact_acceleration) matching the torch forward()."""
    b = q.shape[0]
    hi = jax.lax.Precision.HIGHEST

    # Batch-independent inertia contributions, hoisted out of the kernel.
    inert_row = theta_to_inertia_vector(params["theta"])                 # (1, N_I)
    b_z = jnp.dot(inert_row, params["wd_i"], precision=hi).T             # (K, 1)
    b_f = jnp.dot(inert_row, params["v_i"], precision=hi).T              # (N_V, 1)
    b_all = jnp.concatenate([b_z, b_f], axis=0)                          # (K+N_V, 1)

    # Pack the six per-batch weight matrices into one feature-major weight.
    zeros_vu = jnp.zeros((K_BASIS, N_V + N_U), jnp.float32)
    w_z = jnp.concatenate([params["wd_s"].T, params["wd_c"].T, zeros_vu],
                          axis=1)                                        # (K, N_FEAT)
    w_f = jnp.concatenate([params["v_s"].T, params["v_c"].T,
                           params["v_v"].T, params["v_u"].T], axis=1)    # (N_V, N_FEAT)
    w_all = jnp.concatenate([w_z, w_f], axis=0)                          # (K+N_V, N_FEAT)

    obasis_t = params["o_flat"].T                                        # (NV2, K)
    reg_col = params["reg_row"].T                                        # (NV2, 1)

    # Feature-major data block: raw [q; q; v; u] transposed -> batch on lanes.
    x_t = jnp.concatenate([q, q, v, u], axis=1).T                        # (N_FEAT, B)

    out = pl.pallas_call(
        lagrangian_kernel,
        out_shape=jax.ShapeDtypeStruct((N_OUT, b), jnp.float32),
        grid_spec=pltpu.PrefetchScalarGridSpec(
            num_scalar_prefetch=0,
            grid=(1,),                                                   # single step
            in_specs=[pl.BlockSpec((N_FEAT, b), lambda i: (0, 0)),
                      pl.BlockSpec((N_ZF, N_FEAT), lambda i: (0, 0)),
                      pl.BlockSpec((N_ZF, 1), lambda i: (0, 0)),
                      pl.BlockSpec((NV2, K_BASIS), lambda i: (0, 0)),
                      pl.BlockSpec((NV2, 1), lambda i: (0, 0))],
            out_specs=pl.BlockSpec((N_OUT, b), lambda i: (0, 0)),
        ),
        compiler_params=pltpu.CompilerParams(
            dimension_semantics=("arbitrary",)),
    )(x_t, w_all, b_all, obasis_t, reg_col)

    M = out[:NV2, :].T.reshape(b, N_V, N_V)
    acc = out[NV2:, :].T
    return M, acc


def reference_forward(q, v, u, params):
    inert_row = theta_to_inertia_vector(params["theta"])
    sq, cq = jnp.sin(q), jnp.cos(q)
    hi = jax.lax.Precision.HIGHEST
    z = (jnp.dot(sq, params["wd_s"], precision=hi)
         + jnp.dot(cq, params["wd_c"], precision=hi)
         + jnp.dot(inert_row, params["wd_i"], precision=hi))
    d = _softplus(z)
    m_flat = jnp.dot(d, params["o_flat"], precision=hi) + params["reg_row"]
    M = m_flat.reshape(q.shape[0], N_V, N_V)
    f = (jnp.dot(sq, params["v_s"], precision=hi)
         + jnp.dot(cq, params["v_c"], precision=hi)
         + jnp.dot(v, params["v_v"], precision=hi)
         + jnp.dot(u, params["v_u"], precision=hi)
         + jnp.dot(inert_row, params["v_i"], precision=hi))
    acc = jnp.linalg.solve(M, f[..., None])[..., 0]
    return M, acc


if __name__ == "__main__":
    key = jax.random.PRNGKey(0)
    kp, kq, kv, ku = jax.random.split(key, 4)
    params = init_params(kp)
    q = jax.random.normal(kq, (B, N_Q), jnp.float32)
    v = jax.random.normal(kv, (B, N_V), jnp.float32)
    u = jax.random.normal(ku, (B, N_U), jnp.float32)

    M, acc = jax.jit(lagrangian_terms_forward)(q, v, u, params)
    jax.block_until_ready((M, acc))

    M_ref, acc_ref = reference_forward(q, v, u, params)
    assert M.shape == (B, N_V, N_V) and acc.shape == (B, N_V)
    assert jnp.allclose(M, M_ref, rtol=1e-3, atol=1e-3)
    assert jnp.allclose(acc, acc_ref, rtol=1e-3, atol=1e-3)
    print("KERNEL_OK")
</pallas_src>

<mosaic_0001>
module attributes {stable_mosaic.version = 11 : i64} {
  func.func @lagrangian_kernel(%arg0: i32, %arg1: memref<22x64xf32, #tpu.memory_space<vmem>>, %arg2: memref<38x22xf32, #tpu.memory_space<vmem>>, %arg3: memref<38x1xf32, #tpu.memory_space<vmem>>, %arg4: memref<36x32xf32, #tpu.memory_space<vmem>>, %arg5: memref<36x1xf32, #tpu.memory_space<vmem>>, %arg6: memref<42x64xf32, #tpu.memory_space<vmem>>) attributes {dimension_semantics = [#tpu.dimension_semantics<arbitrary>], iteration_bounds = array<i64: 1>, scalar_prefetch = 0 : i64, scratch_operands = 0 : i64, tpu.core_type = #tpu.core_type<tc>, window_params = [{pipeline_mode = #tpu.pipeline_mode<synchronous>, transform_indices = @transform_0, window_bounds = array<i64: 22, 64>}, {pipeline_mode = #tpu.pipeline_mode<synchronous>, transform_indices = @transform_1, window_bounds = array<i64: 38, 22>}, {pipeline_mode = #tpu.pipeline_mode<synchronous>, transform_indices = @transform_2, window_bounds = array<i64: 38, 1>}, {pipeline_mode = #tpu.pipeline_mode<synchronous>, transform_indices = @transform_3, window_bounds = array<i64: 36, 32>}, {pipeline_mode = #tpu.pipeline_mode<synchronous>, transform_indices = @transform_4, window_bounds = array<i64: 36, 1>}, {pipeline_mode = #tpu.pipeline_mode<synchronous>, transform_indices = @transform_5, window_bounds = array<i64: 42, 64>}]} {
    %c0 = arith.constant 0 : index
    %c0_0 = arith.constant 0 : index
    %0 = vector.load %arg1[%c0, %c0_0] : memref<22x64xf32, #tpu.memory_space<vmem>>, vector<22x64xf32>
    %1 = tpu.iota {dimensions = array<i32: 0>} : vector<22x64xi32>
    %c7_i32 = arith.constant 7 : i32
    %2 = vector.broadcast %c7_i32 : i32 to vector<22x64xi32>
    %3 = arith.cmpi slt, %1, %2 : vector<22x64xi32>
    %4 = math.sin %0 : vector<22x64xf32>
    %c14_i32 = arith.constant 14 : i32
    %5 = vector.broadcast %c14_i32 : i32 to vector<22x64xi32>
    %6 = arith.cmpi slt, %1, %5 : vector<22x64xi32>
    %7 = math.cos %0 : vector<22x64xf32>
    %8 = arith.select %6, %7, %0 : vector<22x64xi1>, vector<22x64xf32>
    %9 = arith.select %3, %4, %8 : vector<22x64xi1>, vector<22x64xf32>
    %c0_1 = arith.constant 0 : index
    %c0_2 = arith.constant 0 : index
    %10 = vector.load %arg2[%c0_1, %c0_2] : memref<38x22xf32, #tpu.memory_space<vmem>>, vector<38x22xf32>
    %cst = arith.constant dense<0.000000e+00> : vector<38x64xf32>
    %11 = tpu.matmul %10, %9, %cst {dimension_numbers = #tpu.dot_dimension_numbers<[1], [0], [0], [1], [0, 0, 1, 1], [], []>} : vector<38x22xf32>, vector<22x64xf32>, vector<38x64xf32> -> vector<38x64xf32>
    %c0_3 = arith.constant 0 : index
    %c0_4 = arith.constant 0 : index
    %12 = vector.load %arg3[%c0_3, %c0_4] : memref<38x1xf32, #tpu.memory_space<vmem>>, vector<38x1xf32>
    %13 = vector.broadcast %12 : vector<38x1xf32> to vector<38x64xf32>
    %14 = arith.addf %11, %13 : vector<38x64xf32>
    %15 = vector.extract_strided_slice %14 {offsets = [0, 0], sizes = [32, 64], strides = [1, 1]} : vector<38x64xf32> to vector<32x64xf32>
    %16 = vector.extract_strided_slice %14 {offsets = [32, 0], sizes = [6, 64], strides = [1, 1]} : vector<38x64xf32> to vector<6x64xf32>
    %cst_5 = arith.constant 0.000000e+00 : f32
    %17 = vector.broadcast %cst_5 : f32 to vector<32x64xf32>
    %18 = arith.maximumf %15, %17 : vector<32x64xf32>
    %19 = math.absf %15 : vector<32x64xf32>
    %cst_6 = arith.constant 0.000000e+00 : f32
    %20 = vector.broadcast %cst_6 : f32 to vector<32x64xf32>
    %21 = arith.subf %20, %19 : vector<32x64xf32>
    %22 = math.exp %21 : vector<32x64xf32>
    %23 = math.log1p %22 : vector<32x64xf32>
    %24 = arith.addf %18, %23 : vector<32x64xf32>
    %c0_7 = arith.constant 0 : index
    %c0_8 = arith.constant 0 : index
    %25 = vector.load %arg4[%c0_7, %c0_8] : memref<36x32xf32, #tpu.memory_space<vmem>>, vector<36x32xf32>
    %cst_9 = arith.constant dense<0.000000e+00> : vector<36x64xf32>
    %26 = tpu.matmul %25, %24, %cst_9 {dimension_numbers = #tpu.dot_dimension_numbers<[1], [0], [0], [1], [0, 0, 1, 1], [], []>} : vector<36x32xf32>, vector<32x64xf32>, vector<36x64xf32> -> vector<36x64xf32>
    %c0_10 = arith.constant 0 : index
    %c0_11 = arith.constant 0 : index
    %27 = vector.load %arg5[%c0_10, %c0_11] : memref<36x1xf32, #tpu.memory_space<vmem>>, vector<36x1xf32>
    %28 = vector.broadcast %27 : vector<36x1xf32> to vector<36x64xf32>
    %29 = arith.addf %26, %28 : vector<36x64xf32>
    %30 = vector.extract_strided_slice %29 {offsets = [0, 0], sizes = [1, 64], strides = [1, 1]} : vector<36x64xf32> to vector<1x64xf32>
    %31 = math.rsqrt %30 : vector<1x64xf32>
    %32 = vector.extract_strided_slice %29 {offsets = [6, 0], sizes = [1, 64], strides = [1, 1]} : vector<36x64xf32> to vector<1x64xf32>
    %33 = arith.mulf %32, %31 : vector<1x64xf32>
    %34 = vector.extract_strided_slice %29 {offsets = [7, 0], sizes = [1, 64], strides = [1, 1]} : vector<36x64xf32> to vector<1x64xf32>
    %35 = arith.mulf %33, %33 : vector<1x64xf32>
    %36 = arith.subf %34, %35 : vector<1x64xf32>
    %37 = math.rsqrt %36 : vector<1x64xf32>
    %38 = vector.extract_strided_slice %29 {offsets = [12, 0], sizes = [1, 64], strides = [1, 1]} : vector<36x64xf32> to vector<1x64xf32>
    %39 = arith.mulf %38, %31 : vector<1x64xf32>
    %40 = vector.extract_strided_slice %29 {offsets = [13, 0], sizes = [1, 64], strides = [1, 1]} : vector<36x64xf32> to vector<1x64xf32>
    %41 = arith.mulf %39, %33 : vector<1x64xf32>
    %42 = arith.subf %40, %41 : vector<1x64xf32>
    %43 = arith.mulf %42, %37 : vector<1x64xf32>
    %44 = vector.extract_strided_slice %29 {offsets = [14, 0], sizes = [1, 64], strides = [1, 1]} : vector<36x64xf32> to vector<1x64xf32>
    %45 = arith.mulf %39, %39 : vector<1x64xf32>
    %46 = arith.subf %44, %45 : vector<1x64xf32>
    %47 = arith.mulf %43, %43 : vector<1x64xf32>
    %48 = arith.subf %46, %47 : vector<1x64xf32>
    %49 = math.rsqrt %48 : vector<1x64xf32>
    %50 = vector.extract_strided_slice %29 {offsets = [18, 0], sizes = [1, 64], strides = [1, 1]} : vector<36x64xf32> to vector<1x64xf32>
    %51 = arith.mulf %50, %31 : vector<1x64xf32>
    %52 = vector.extract_strided_slice %29 {offsets = [19, 0], sizes = [1, 64], strides = [1, 1]} : vector<36x64xf32> to vector<1x64xf32>
    %53 = arith.mulf %51, %33 : vector<1x64xf32>
    %54 = arith.subf %52, %53 : vector<1x64xf32>
    %55 = arith.mulf %54, %37 : vector<1x64xf32>
    %56 = vector.extract_strided_slice %29 {offsets = [20, 0], sizes = [1, 64], strides = [1, 1]} : vector<36x64xf32> to vector<1x64xf32>
    %57 = arith.mulf %51, %39 : vector<1x64xf32>
    %58 = arith.subf %56, %57 : vector<1x64xf32>
    %59 = arith.mulf %55, %43 : vector<1x64xf32>
    %60 = arith.subf %58, %59 : vector<1x64xf32>
    %61 = arith.mulf %60, %49 : vector<1x64xf32>
    %62 = vector.extract_strided_slice %29 {offsets = [21, 0], sizes = [1, 64], strides = [1, 1]} : vector<36x64xf32> to vector<1x64xf32>
    %63 = arith.mulf %51, %51 : vector<1x64xf32>
    %64 = arith.subf %62, %63 : vector<1x64xf32>
    %65 = arith.mulf %55, %55 : vector<1x64xf32>
    %66 = arith.subf %64, %65 : vector<1x64xf32>
    %67 = arith.mulf %61, %61 : vector<1x64xf32>
    %68 = arith.subf %66, %67 : vector<1x64xf32>
    %69 = math.rsqrt %68 : vector<1x64xf32>
    %70 = vector.extract_strided_slice %29 {offsets = [24, 0], sizes = [1, 64], strides = [1, 1]} : vector<36x64xf32> to vector<1x64xf32>
    %71 = arith.mulf %70, %31 : vector<1x64xf32>
    %72 = vector.extract_strided_slice %29 {offsets = [25, 0], sizes = [1, 64], strides = [1, 1]} : vector<36x64xf32> to vector<1x64xf32>
    %73 = arith.mulf %71, %33 : vector<1x64xf32>
    %74 = arith.subf %72, %73 : vector<1x64xf32>
    %75 = arith.mulf %74, %37 : vector<1x64xf32>
    %76 = vector.extract_strided_slice %29 {offsets = [26, 0], sizes = [1, 64], strides = [1, 1]} : vector<36x64xf32> to vector<1x64xf32>
    %77 = arith.mulf %71, %39 : vector<1x64xf32>
    %78 = arith.subf %76, %77 : vector<1x64xf32>
    %79 = arith.mulf %75, %43 : vector<1x64xf32>
    %80 = arith.subf %78, %79 : vector<1x64xf32>
    %81 = arith.mulf %80, %49 : vector<1x64xf32>
    %82 = vector.extract_strided_slice %29 {offsets = [27, 0], sizes = [1, 64], strides = [1, 1]} : vector<36x64xf32> to vector<1x64xf32>
    %83 = arith.mulf %71, %51 : vector<1x64xf32>
    %84 = arith.subf %82, %83 : vector<1x64xf32>
    %85 = arith.mulf %75, %55 : vector<1x64xf32>
    %86 = arith.subf %84, %85 : vector<1x64xf32>
    %87 = arith.mulf %81, %61 : vector<1x64xf32>
    %88 = arith.subf %86, %87 : vector<1x64xf32>
    %89 = arith.mulf %88, %69 : vector<1x64xf32>
    %90 = vector.extract_strided_slice %29 {offsets = [28, 0], sizes = [1, 64], strides = [1, 1]} : vector<36x64xf32> to vector<1x64xf32>
    %91 = arith.mulf %71, %71 : vector<1x64xf32>
    %92 = arith.subf %90, %91 : vector<1x64xf32>
    %93 = arith.mulf %75, %75 : vector<1x64xf32>
    %94 = arith.subf %92, %93 : vector<1x64xf32>
    %95 = arith.mulf %81, %81 : vector<1x64xf32>
    %96 = arith.subf %94, %95 : vector<1x64xf32>
    %97 = arith.mulf %89, %89 : vector<1x64xf32>
    %98 = arith.subf %96, %97 : vector<1x64xf32>
    %99 = math.rsqrt %98 : vector<1x64xf32>
    %100 = vector.extract_strided_slice %29 {offsets = [30, 0], sizes = [1, 64], strides = [1, 1]} : vector<36x64xf32> to vector<1x64xf32>
    %101 = arith.mulf %100, %31 : vector<1x64xf32>
    %102 = vector.extract_strided_slice %29 {offsets = [31, 0], sizes = [1, 64], strides = [1, 1]} : vector<36x64xf32> to vector<1x64xf32>
    %103 = arith.mulf %101, %33 : vector<1x64xf32>
    %104 = arith.subf %102, %103 : vector<1x64xf32>
    %105 = arith.mulf %104, %37 : vector<1x64xf32>
    %106 = vector.extract_strided_slice %29 {offsets = [32, 0], sizes = [1, 64], strides = [1, 1]} : vector<36x64xf32> to vector<1x64xf32>
    %107 = arith.mulf %101, %39 : vector<1x64xf32>
    %108 = arith.subf %106, %107 : vector<1x64xf32>
    %109 = arith.mulf %105, %43 : vector<1x64xf32>
    %110 = arith.subf %108, %109 : vector<1x64xf32>
    %111 = arith.mulf %110, %49 : vector<1x64xf32>
    %112 = vector.extract_strided_slice %29 {offsets = [33, 0], sizes = [1, 64], strides = [1, 1]} : vector<36x64xf32> to vector<1x64xf32>
    %113 = arith.mulf %101, %51 : vector<1x64xf32>
    %114 = arith.subf %112, %113 : vector<1x64xf32>
    %115 = arith.mulf %105, %55 : vector<1x64xf32>
    %116 = arith.subf %114, %115 : vector<1x64xf32>
    %117 = arith.mulf %111, %61 : vector<1x64xf32>
    %118 = arith.subf %116, %117 : vector<1x64xf32>
    %119 = arith.mulf %118, %69 : vector<1x64xf32>
    %120 = vector.extract_strided_slice %29 {offsets = [34, 0], sizes = [1, 64], strides = [1, 1]} : vector<36x64xf32> to vector<1x64xf32>
    %121 = arith.mulf %101, %71 : vector<1x64xf32>
    %122 = arith.subf %120, %121 : vector<1x64xf32>
    %123 = arith.mulf %105, %75 : vector<1x64xf32>
    %124 = arith.subf %122, %123 : vector<1x64xf32>
    %125 = arith.mulf %111, %81 : vector<1x64xf32>
    %126 = arith.subf %124, %125 : vector<1x64xf32>
    %127 = arith.mulf %119, %89 : vector<1x64xf32>
    %128 = arith.subf %126, %127 : vector<1x64xf32>
    %129 = arith.mulf %128, %99 : vector<1x64xf32>
    %130 = vector.extract_strided_slice %29 {offsets = [35, 0], sizes = [1, 64], strides = [1, 1]} : vector<36x64xf32> to vector<1x64xf32>
    %131 = arith.mulf %101, %101 : vector<1x64xf32>
    %132 = arith.subf %130, %131 : vector<1x64xf32>
    %133 = arith.mulf %105, %105 : vector<1x64xf32>
    %134 = arith.subf %132, %133 : vector<1x64xf32>
    %135 = arith.mulf %111, %111 : vector<1x64xf32>
    %136 = arith.subf %134, %135 : vector<1x64xf32>
    %137 = arith.mulf %119, %119 : vector<1x64xf32>
    %138 = arith.subf %136, %137 : vector<1x64xf32>
    %139 = arith.mulf %129, %129 : vector<1x64xf32>
    %140 = arith.subf %138, %139 : vector<1x64xf32>
    %141 = math.rsqrt %140 : vector<1x64xf32>
    %142 = vector.extract_strided_slice %16 {offsets = [0, 0], sizes = [1, 64], strides = [1, 1]} : vector<6x64xf32> to vector<1x64xf32>
    %143 = arith.mulf %142, %31 : vector<1x64xf32>
    %144 = vector.extract_strided_slice %16 {offsets = [1, 0], sizes = [1, 64], strides = [1, 1]} : vector<6x64xf32> to vector<1x64xf32>
    %145 = arith.mulf %33, %143 : vector<1x64xf32>
    %146 = arith.subf %144, %145 : vector<1x64xf32>
    %147 = arith.mulf %146, %37 : vector<1x64xf32>
    %148 = vector.extract_strided_slice %16 {offsets = [2, 0], sizes = [1, 64], strides = [1, 1]} : vector<6x64xf32> to vector<1x64xf32>
    %149 = arith.mulf %39, %143 : vector<1x64xf32>
    %150 = arith.subf %148, %149 : vector<1x64xf32>
    %151 = arith.mulf %43, %147 : vector<1x64xf32>
    %152 = arith.subf %150, %151 : vector<1x64xf32>
    %153 = arith.mulf %152, %49 : vector<1x64xf32>
    %154 = vector.extract_strided_slice %16 {offsets = [3, 0], sizes = [1, 64], strides = [1, 1]} : vector<6x64xf32> to vector<1x64xf32>
    %155 = arith.mulf %51, %143 : vector<1x64xf32>
    %156 = arith.subf %154, %155 : vector<1x64xf32>
    %157 = arith.mulf %55, %147 : vector<1x64xf32>
    %158 = arith.subf %156, %157 : vector<1x64xf32>
    %159 = arith.mulf %61, %153 : vector<1x64xf32>
    %160 = arith.subf %158, %159 : vector<1x64xf32>
    %161 = arith.mulf %160, %69 : vector<1x64xf32>
    %162 = vector.extract_strided_slice %16 {offsets = [4, 0], sizes = [1, 64], strides = [1, 1]} : vector<6x64xf32> to vector<1x64xf32>
    %163 = arith.mulf %71, %143 : vector<1x64xf32>
    %164 = arith.subf %162, %163 : vector<1x64xf32>
    %165 = arith.mulf %75, %147 : vector<1x64xf32>
    %166 = arith.subf %164, %165 : vector<1x64xf32>
    %167 = arith.mulf %81, %153 : vector<1x64xf32>
    %168 = arith.subf %166, %167 : vector<1x64xf32>
    %169 = arith.mulf %89, %161 : vector<1x64xf32>
    %170 = arith.subf %168, %169 : vector<1x64xf32>
    %171 = arith.mulf %170, %99 : vector<1x64xf32>
    %172 = vector.extract_strided_slice %16 {offsets = [5, 0], sizes = [1, 64], strides = [1, 1]} : vector<6x64xf32> to vector<1x64xf32>
    %173 = arith.mulf %101, %143 : vector<1x64xf32>
    %174 = arith.subf %172, %173 : vector<1x64xf32>
    %175 = arith.mulf %105, %147 : vector<1x64xf32>
    %176 = arith.subf %174, %175 : vector<1x64xf32>
    %177 = arith.mulf %111, %153 : vector<1x64xf32>
    %178 = arith.subf %176, %177 : vector<1x64xf32>
    %179 = arith.mulf %119, %161 : vector<1x64xf32>
    %180 = arith.subf %178, %179 : vector<1x64xf32>
    %181 = arith.mulf %129, %171 : vector<1x64xf32>
    %182 = arith.subf %180, %181 : vector<1x64xf32>
    %183 = arith.mulf %182, %141 : vector<1x64xf32>
    %184 = arith.mulf %183, %141 : vector<1x64xf32>
    %185 = arith.mulf %129, %184 : vector<1x64xf32>
    %186 = arith.subf %171, %185 : vector<1x64xf32>
    %187 = arith.mulf %186, %99 : vector<1x64xf32>
    %188 = arith.mulf %89, %187 : vector<1x64xf32>
    %189 = arith.subf %161, %188 : vector<1x64xf32>
    %190 = arith.mulf %119, %184 : vector<1x64xf32>
    %191 = arith.subf %189, %190 : vector<1x64xf32>
    %192 = arith.mulf %191, %69 : vector<1x64xf32>
    %193 = arith.mulf %61, %192 : vector<1x64xf32>
    %194 = arith.subf %153, %193 : vector<1x64xf32>
    %195 = arith.mulf %81, %187 : vector<1x64xf32>
    %196 = arith.subf %194, %195 : vector<1x64xf32>
    %197 = arith.mulf %111, %184 : vector<1x64xf32>
    %198 = arith.subf %196, %197 : vector<1x64xf32>
    %199 = arith.mulf %198, %49 : vector<1x64xf32>
    %200 = arith.mulf %43, %199 : vector<1x64xf32>
    %201 = arith.subf %147, %200 : vector<1x64xf32>
    %202 = arith.mulf %55, %192 : vector<1x64xf32>
    %203 = arith.subf %201, %202 : vector<1x64xf32>
    %204 = arith.mulf %75, %187 : vector<1x64xf32>
    %205 = arith.subf %203, %204 : vector<1x64xf32>
    %206 = arith.mulf %105, %184 : vector<1x64xf32>
    %207 = arith.subf %205, %206 : vector<1x64xf32>
    %208 = arith.mulf %207, %37 : vector<1x64xf32>
    %209 = arith.mulf %33, %208 : vector<1x64xf32>
    %210 = arith.subf %143, %209 : vector<1x64xf32>
    %211 = arith.mulf %39, %199 : vector<1x64xf32>
    %212 = arith.subf %210, %211 : vector<1x64xf32>
    %213 = arith.mulf %51, %192 : vector<1x64xf32>
    %214 = arith.subf %212, %213 : vector<1x64xf32>
    %215 = arith.mulf %71, %187 : vector<1x64xf32>
    %216 = arith.subf %214, %215 : vector<1x64xf32>
    %217 = arith.mulf %101, %184 : vector<1x64xf32>
    %218 = arith.subf %216, %217 : vector<1x64xf32>
    %219 = arith.mulf %218, %31 : vector<1x64xf32>
    %220 = tpu.concatenate %29, %219, %208, %199, %192, %187, %184 in 0 : vector<36x64xf32>, vector<1x64xf32>, vector<1x64xf32>, vector<1x64xf32>, vector<1x64xf32>, vector<1x64xf32>, vector<1x64xf32> -> vector<42x64xf32>
    %c0_12 = arith.constant 0 : index
    %c0_13 = arith.constant 0 : index
    %221 = vector.load %arg6[%c0_12, %c0_13] : memref<42x64xf32, #tpu.memory_space<vmem>>, vector<42x64xf32>
    tpu.vector_store %arg6[%c0_12, %c0_13], %220 {strides = array<i32>} : memref<42x64xf32, #tpu.memory_space<vmem>>, vector<42x64xf32>,
    return
  }
  func.func @transform_0(%arg0: i32) -> (i32, i32) {
    %c0_i32 = arith.constant 0 : i32
    %c0_i32_0 = arith.constant 0 : i32
    %c0_i32_1 = arith.constant 0 : i32
    return %c0_i32, %c0_i32_0 : i32, i32
  }
  func.func @transform_1(%arg0: i32) -> (i32, i32) {
    %c0_i32 = arith.constant 0 : i32
    %c0_i32_0 = arith.constant 0 : i32
    %c0_i32_1 = arith.constant 0 : i32
    return %c0_i32, %c0_i32_0 : i32, i32
  }
  func.func @transform_2(%arg0: i32) -> (i32, i32) {
    %c0_i32 = arith.constant 0 : i32
    %c0_i32_0 = arith.constant 0 : i32
    %c0_i32_1 = arith.constant 0 : i32
    return %c0_i32, %c0_i32_0 : i32, i32
  }
  func.func @transform_3(%arg0: i32) -> (i32, i32) {
    %c0_i32 = arith.constant 0 : i32
    %c0_i32_0 = arith.constant 0 : i32
    %c0_i32_1 = arith.constant 0 : i32
    return %c0_i32, %c0_i32_0 : i32, i32
  }
  func.func @transform_4(%arg0: i32) -> (i32, i32) {
    %c0_i32 = arith.constant 0 : i32
    %c0_i32_0 = arith.constant 0 : i32
    %c0_i32_1 = arith.constant 0 : i32
    return %c0_i32, %c0_i32_0 : i32, i32
  }
  func.func @transform_5(%arg0: i32) -> (i32, i32) {
    %c0_i32 = arith.constant 0 : i32
    %c0_i32_0 = arith.constant 0 : i32
    %c0_i32_1 = arith.constant 0 : i32
    return %c0_i32, %c0_i32_0 : i32, i32
  }
}

</mosaic_0001>

<bundles_post_ra>
// kernel: lagrangian_terms_forward.1
= control target key start
LH: loop header
LB: loop body
LE: loop exit
PB: predicated region body
PF: predicated region fallthrough
CT: control target
= control target key end

     0   :  { %v1835_v0 = vmov 0   ;;  %v1836_v23 = vmov 683565275   ;;  %v1837_v25 = vmov 2475754826   ;;  %vm1017_vm15 = vcmask 1045504   ;;  %s2350_s2 = inlined_call_operand.vmem [shape: f32[38,1], index: 2, kind: input, shape index: {}]   ;;  %s2351_s0 = inlined_call_operand.vmem [shape: f32[22,64], index: 0, kind: input, shape index: {}]   ;;  %s2352_s4 = inlined_call_operand.vmem [shape: f32[36,1], index: 4, kind: input, shape index: {}]   ;;  %s2353_s1 = inlined_call_operand.vmem [shape: f32[38,22], index: 1, kind: input, shape index: {}]   ;;  %s2354_s3 = inlined_call_operand.vmem [shape: f32[36,32], index: 3, kind: input, shape index: {}]   ;;  %s2355_s5 = inlined_call_operand.vmem [shape: f32[42,64], index: 5, kind: output, shape index: {}]  }
   0x1   :  { %1804 = vset.pattern.permute.xlu0 %v1835_v0  ;;  %v974_v1 = vld [vmem:[%s2350_s2 + $0x18] sm:$0xff]  ;;  %v1879_v2 = vld [vmem:[%s2351_s0] sm:$0xff]  ;;  %v1884_v3 = vld [vmem:[%s2351_s0 + $0x8] sm:$0xff]  ;;  %1805 = vset.pattern.permute.xlu1 %v1835_v0  ;;  %v1838_v27 = vmov 2131351028  }
   0x2   :  { %993 = vperm.xlu0 %1804, %v974_v1   ;;  %v30_v4 = vand.u32 2147483647, %v1879_v2  ;;  %v33_v5 = vand.u32 2139095040, %v1879_v2  ;;  %1806 = vset.pattern.permute.xlu2 %v1835_v0  ;;  %v655_v8 = vand.u32 2139095040, %v1884_v3  ;;  %v652_v9 = vand.u32 2147483647, %v1884_v3 }
   0x3   :  { %v1839_v29 = vmov 2102212464   ;;  %v1840_v31 = vmov 920167782   ;;  %v1841_v41 = vmov 1326507024  }
   0x4   :  { %v34_v6 = vshrl.u32 %v33_v5, 23  ;;  %v37_v7 = vand.u32 8388607, %v30_v4  ;;  %v656_v11 = vshrl.u32 %v655_v8, 23  ;;  %v659_v15 = vand.u32 8388607, %v652_v9 }
   0x6   :  { %v1761_v10 = vadd.s32 4294967169, %v34_v6  ;;  %v38_v12 = vor.u32 8388608, %v37_v7  ;;  %v1773_v14 = vadd.s32 4294967169, %v656_v11  ;;  %v660_v21 = vor.u32 8388608, %v659_v15 }
   0x8   :  { %v40_v13 = vadd.s32 1, %v1761_v10  ;;  %v662_v16 = vadd.s32 1, %v1773_v14  ;;  %v1896_v18 = vshll.u32 %v38_v12, 8  ;;  %v1925_v12 = vshll.u32 %v660_v21, 8 }
   0xa   :  { %vm41_vm0 = vcmp.gt.s32.totalorder %v40_v13, 0  ;;  %vm663_vm1 = vcmp.gt.s32.totalorder %v662_v16, 0  ;;  %v79_v33 = vand.u32 65535, %v1896_v18  ;;  %v80_v34 = vshrl.u32 %v1896_v18, 16 }
   0xb   :  { %v42_v17 = vsel %vm41_vm0, %v40_v13, 0  ;;  %v664_v38 = vsel %vm663_vm1, %v662_v16, 0 }
   0xc   :  { %v44_v19 = vand.u32 31, %v42_v17  ;;  %v43_v20 = vshrl.u32 %v42_v17, 5  ;;  %v1909_v48 = vand.u32 31, %v664_v38  ;;  %v1918_v62 = vshrl.u32 %v664_v38, 5 }
   0xe   :  { %v45_v22 = vsub.s32 32, %v44_v19  ;;  %v47_v24 = vshll.u32 %v1836_v23, %v44_v19  ;;  %v50_v26 = vshll.u32 %v1837_v25, %v44_v19  ;;  %v53_v28 = vshll.u32 %v1838_v27, %v44_v19 }
   0xf   :  { %v56_v30 = vshll.u32 %v1839_v29, %v44_v19  ;;  %v59_v32 = vshll.u32 %v1840_v31, %v44_v19  ;;  %vm62_vm2 = vcmp.lt.s32.totalorder %v43_v20, 1  ;;  %vm65_vm3 = vcmp.lt.s32.totalorder %v43_v20, 4 }
  0x10   :  { %v48_v35 = vshrl.u32 %v1837_v25, %v45_v22  ;;  %v51_v36 = vshrl.u32 %v1838_v27, %v45_v22  ;;  %v54_v37 = vshrl.u32 %v1839_v29, %v45_v22  ;;  %v46_v39 = vshrl.u32 %v1836_v23, %v45_v22 }
  0x11   :  { %v57_v40 = vshrl.u32 %v1840_v31, %v45_v22  ;;  %v60_v42 = vshrl.u32 %v1841_v41, %v45_v22  ;;  %vm64_vm4 = vcmp.lt.s32.totalorder %v43_v20, 3  ;;  %vm63_vm5 = vcmp.lt.s32.totalorder %v43_v20, 2 }
  0x12   :  { %v49_v43 = vor.u32 %v48_v35, %v47_v24  ;;  %v52_v44 = vor.u32 %v51_v36, %v50_v26  ;;  %v55_v45 = vor.u32 %v54_v37, %v53_v28  ;;  %v1912_v55 = vsub.s32 32, %v1909_v48 }
  0x13   :  { %v58_v46 = vor.u32 %v57_v40, %v56_v30  ;;  %v61_v47 = vor.u32 %v60_v42, %v59_v32  ;;  %v678_v59 = vshll.u32 %v1839_v29, %v1909_v48  ;;  %v681_v11 = vshll.u32 %v1840_v31, %v1909_v48 }
  0x14   :  { %v67_v49 = vsel %vm65_vm3, %v55_v45, 2102212464  ;;  %v70_v50 = vsel %vm62_vm2, %v49_v43, %v52_v44  ;;  %v74_v51 = vsel %vm62_vm2, %v52_v44, %v55_v45  ;;  %v66_v52 = vsel %vm62_vm2, %v46_v39, %v49_v43 }
  0x15   :  { %v71_v53 = vsel %vm65_vm3, %v58_v46, 920167782  ;;  %v75_v54 = vsel %vm65_vm3, %v61_v47, 1326507024  ;;  %v68_v56 = vsel %vm64_vm4, %v52_v44, %v67_v49  ;;  %v679_v63 = vshrl.u32 %v1840_v31, %v1912_v55 }
  0x16   :  { %v72_v57 = vsel %vm64_vm4, %v55_v45, %v71_v53  ;;  %v76_v58 = vsel %vm64_vm4, %v58_v46, %v75_v54  ;;  %v1922_v8 = vsel %vm63_vm5, %v66_v52, %v68_v56  ;;  %v682_v16 = vshrl.u32 %v1841_v41, %v1912_v55 }
  0x17   :  { %v73_v60 = vsel %vm63_vm5, %v70_v50, %v72_v57  ;;  %v77_v61 = vsel %vm63_vm5, %v74_v51, %v76_v58  ;;  %v680_v10 = vor.u32 %v679_v63, %v678_v59  ;;  %vm687_vm6 = vcmp.lt.s32.totalorder %v1918_v62, 4 }
  0x18   :  { %v81_v1 = vand.u32 65535, %v77_v61  ;;  %v82_v5 = vshrl.u32 %v77_v61, 16  ;;  %v103_v6 = vand.u32 65535, %v73_v60  ;;  %v104_v7 = vshrl.u32 %v73_v60, 16 }
  0x19   :  { %v683_v37 = vor.u32 %v682_v16, %v681_v11  ;;  %v669_v47 = vshll.u32 %v1836_v23, %v1909_v48  ;;  %v670_v49 = vshrl.u32 %v1837_v25, %v1912_v55  ;;  %v672_v51 = vshll.u32 %v1837_v25, %v1909_v48 }
  0x1a   :  { %v83_v13 = vmul.u32 %v81_v1, %v79_v33  ;;  %v84_v14 = vmul.u32 %v82_v5, %v79_v33  ;;  %v85_v15 = vmul.u32 %v81_v1, %v80_v34  ;;  %v105_v17 = vmul.u32 %v103_v6, %v79_v33 }
  0x1b   :  { %v106_v19 = vmul.u32 %v104_v7, %v79_v33  ;;  %v107_v22 = vmul.u32 %v103_v6, %v80_v34  ;;  %v86_v24 = vmul.u32 %v82_v5, %v80_v34  ;;  %v108_v28 = vmul.u32 %v104_v7, %v80_v34 }
  0x1c   :  { %v87_v26 = vshll.u32 %v84_v14, 16  ;;  %v89_v20 = vshll.u32 %v85_v15, 16  ;;  %v88_v30 = vshrl.u32 %v84_v14, 16  ;;  %v90_v32 = vshrl.u32 %v85_v15, 16 }
  0x1d   :  { %v109_v35 = vshll.u32 %v106_v19, 16  ;;  %v111_v31 = vshll.u32 %v107_v22, 16  ;;  %v110_v36 = vshrl.u32 %v106_v19, 16  ;;  %v112_v39 = vshrl.u32 %v107_v22, 16 }
  0x1e   :  { %vm91_vm7 = vc.u32 %v83_v13, %v87_v26  ;;  %v93_v21 = vadd.s32 %v87_v26, %v83_v13  ;;  %v697_v34 = vsel %vm687_vm6, %v683_v37, 1326507024  ;;  %v673_v52 = vshrl.u32 %v1838_v27, %v1912_v55 }
  0x1f   :  { %v92_v38 = vsel %vm91_vm7, 1, %v1835_v0  ;;  %vm113_vm8 = vc.u32 %v105_v17, %v109_v35  ;;  %v115_v33 = vadd.s32 %v109_v35, %v105_v17  ;;  %v675_v53 = vshll.u32 %v1838_v27, %v1909_v48 }
  0x20   :  { %v94_v40 = vadd.s32 %v92_v38, %v86_v24  ;;  %vm95_vm9 = vc.u32 %v93_v21, %v89_v20  ;;  %v114_v41 = vsel %vm113_vm8, 1, %v1835_v0  ;;  %v671_v56 = vor.u32 %v670_v49, %v669_v47  ;;  %v22_v24 = vld [vmem:[%s2351_s0 + $0x10] sm:$0x3f] }
  0x21   :  { %v96_v42 = vsel %vm95_vm9, 1, %v1835_v0  ;;  %v116_v43 = vadd.s32 %v114_v41, %v108_v28  ;;  %vm117_vm10 = vc.u32 %v115_v33, %v111_v31  ;;  %v1934_v44 = vadd.s32 %v115_v33, %v111_v31  ;;  %1779 = vmatpush.msk.msra.mxu0 %vm1017_vm15, %v22_v24  ;;  %1790 = vmatpush.msk.msra.mxu3 %vm1017_vm15, %v22_v24 }
  0x22   :  { %v98_v45 = vadd.s32 %v96_v42, %v94_v40  ;;  %v118_v46 = vsel %vm117_vm10, 1, %v1835_v0  ;;  %v676_v57 = vshrl.u32 %v1839_v29, %v1912_v55  ;;  %vm684_vm11 = vcmp.lt.s32.totalorder %v1918_v62, 1 }
  0x23   :  { %v120_v50 = vadd.s32 %v118_v46, %v116_v43  ;;  %v693_v59 = vsel %vm687_vm6, %v680_v10, 920167782  ;;  %v674_v60 = vor.u32 %v673_v52, %v672_v51  ;;  %vm686_vm12 = vcmp.lt.s32.totalorder %v1918_v62, 3 }
  0x24   :  { %v99_v54 = vadd.s32 %v98_v45, %v88_v30  ;;  %v677_v61 = vor.u32 %v676_v57, %v675_v53  ;;  %vm685_vm13 = vcmp.lt.s32.totalorder %v1918_v62, 2  ;;  %v698_v29 = vsel %vm686_vm12, %v680_v10, %v697_v34 }
  0x25   :  { %v121_v58 = vadd.s32 %v120_v50, %v110_v36  ;;  %v692_v48 = vsel %vm684_vm11, %v671_v56, %v674_v60  ;;  %v123_v63 = vmul.u32 %v1896_v18, %v1922_v8  ;;  %v701_v5 = vand.u32 65535, %v1925_v12 }
  0x26   :  { %v1953_v25 = vadd.s32 %v99_v54, %v90_v32  ;;  %v694_v1 = vsel %vm686_vm12, %v677_v61, %v693_v59  ;;  %v696_v11 = vsel %vm684_vm11, %v674_v60, %v677_v61  ;;  %v702_v10 = vshrl.u32 %v1925_v12, 16 }
  0x27   :  { %v122_v27 = vadd.s32 %v121_v58, %v112_v39  ;;  %v695_v7 = vsel %vm685_vm13, %v692_v48, %v694_v1  ;;  %v699_v18 = vsel %vm685_vm13, %v696_v11, %v698_v29  ;;  %v668_v19 = vshrl.u32 %v1836_v23, %v1912_v55 }
  0x28   :  { %vm125_vm14 = vc.u32 %v1953_v25, %v1934_v44  ;;  %v725_v8 = vand.u32 65535, %v695_v7  ;;  %v726_v13 = vshrl.u32 %v695_v7, 16  ;;  %v703_v15 = vand.u32 65535, %v699_v18 }
  0x29   :  { %v126_v6 = vadd.s32 1, %v122_v27  ;;  %v704_v16 = vshrl.u32 %v699_v18, 16  ;;  %v689_v26 = vsel %vm687_vm6, %v677_v61, 2102212464  ;;  %v688_v39 = vsel %vm684_vm11, %v668_v19, %v671_v56 }
  0x2a   :  { %v728_v22 = vmul.u32 %v726_v13, %v701_v5  ;;  %v707_v28 = vmul.u32 %v703_v15, %v702_v10  ;;  %v729_v30 = vmul.u32 %v725_v8, %v702_v10  ;;  %v705_v35 = vmul.u32 %v703_v15, %v701_v5 }
  0x2b   :  { %v127_v14 = vsel %vm125_vm14, %v126_v6, %v122_v27  ;;  %v706_v20 = vmul.u32 %v704_v16, %v701_v5  ;;  %v727_v31 = vmul.u32 %v725_v8, %v701_v5  ;;  %v708_v36 = vmul.u32 %v704_v16, %v702_v10 }
  0x2c   :  { %v128_v17 = vadd.s32 %v127_v14, %v123_v63  ;;  %v731_v21 = vshll.u32 %v728_v22, 16  ;;  %v711_v55 = vshll.u32 %v707_v28, 16  ;;  %v730_v38 = vmul.u32 %v726_v13, %v702_v10 }
  0x2d   :  { %v709_v23 = vshll.u32 %v706_v20, 16  ;;  %v690_v33 = vsel %vm686_vm12, %v674_v60, %v689_v26  ;;  %v733_v40 = vshll.u32 %v729_v30, 16  ;;  %v710_v42 = vshrl.u32 %v706_v20, 16 }
  0x2e   :  { %v129_v32 = vadd.s32 536870912, %v128_v17  ;;  %vm735_vm1 = vc.u32 %v727_v31, %v731_v21  ;;  %v737_v46 = vadd.s32 %v731_v21, %v727_v31  ;;  %v712_v51 = vshrl.u32 %v707_v28, 16 }
  0x2f   :  { %vm713_vm0 = vc.u32 %v705_v35, %v709_v23  ;;  %v715_v34 = vadd.s32 %v709_v23, %v705_v35  ;;  %v736_v45 = vsel %vm735_vm1, 1, %v1835_v0  ;;  %v732_v53 = vshrl.u32 %v728_v22, 16 }
  0x30   :  { %v1981_v37 = vshrl.u32 %v129_v32, 30  ;;  %v714_v43 = vsel %vm713_vm0, 1, %v1835_v0  ;;  %v738_v50 = vadd.s32 %v736_v45, %v730_v38  ;;  %vm739_vm3 = vc.u32 %v737_v46, %v733_v40 }
  0x31   :  { %v716_v49 = vadd.s32 %v714_v43, %v708_v36  ;;  %vm717_vm2 = vc.u32 %v715_v34, %v711_v55  ;;  %v740_v57 = vsel %vm739_vm3, 1, %v1835_v0  ;;  %v734_v58 = vshrl.u32 %v729_v30, 16 }
  0x32   :  { %v131_v41 = vshll.u32 %v1981_v37, 30  ;;  %v718_v52 = vsel %vm717_vm2, 1, %v1835_v0  ;;  %v742_v59 = vadd.s32 %v740_v57, %v738_v50  ;;  %v741_v27 = vadd.s32 %v737_v46, %v733_v40 }
  0x33   :  { %v720_v56 = vadd.s32 %v718_v52, %v716_v49  ;;  %v691_v29 = vsel %vm685_vm13, %v688_v39, %v690_v33  ;;  %v124_v11 = vadd.s32 %v1934_v44, %v1953_v25  ;;  %vm32_vm7 = vcmp.lt.s32.totalorder %v1879_v2, 0 }
  0x34   :  { %v132_v47 = vsub.s32 %v128_v17, %v131_v41  ;;  %v743_v63 = vadd.s32 %v742_v59, %v732_v53  ;;  %v745_v7 = vmul.u32 %v1925_v12, %v691_v29  ;;  %vm2005_vm9 = vcmp.le.f32.partialorder %v30_v4, 0.7853982  ;;  %v970_v29 = vld [vmem:[%s2353_s1 + $0x20] sm:$0x3f] }
  0x35   :  { %v721_v61 = vadd.s32 %v720_v56, %v710_v42  ;;  %v154_v52 = vsub.s32 4, %v1981_v37  ;;  %vm654_vm11 = vcmp.lt.s32.totalorder %v1884_v3, 0  ;;  %vm2027_vm12 = vcmp.le.f32.partialorder %v652_v9, 0.7853982 }
  0x36   :  { %vm133_vm4 = vcmp.lt.s32.totalorder %v132_v47, 0  ;;  %v134_v54 = vsub.s32 0, %v132_v47  ;;  %v744_v6 = vadd.s32 %v743_v63, %v734_v58 }
  0x37   :  { %v722_v1 = vadd.s32 %v721_v61, %v712_v51  ;;  %v155_v59 = vsel %vm32_vm7, %v154_v52, %v1981_v37  ;;  %v972_v61 = vld [vmem:[%s2350_s2 + $0x8] sm:$0xff] }
  0x38   :  { %v135_v60 = vsel %vm133_vm4, %v134_v54, %v132_v47  ;;  %v748_v0 = vadd.s32 1, %v744_v6  ;;  %983 = vperm.xlu1 %1805, %v972_v61   ;;  %v157_v63 = vsel %vm2005_vm9, 0, %v155_v59  ;;  %v968_v59 = vld [vmem:[%s2353_s1 + $0x10] sm:$0xff] }
  0x39   :  { %v136_v48 = vclz %v135_v60  ;;  %vm747_vm5 = vc.u32 %v722_v1, %v741_v27  ;;  %v746_v39 = vadd.s32 %v741_v27, %v722_v1  ;;  %v973_v60 = vld [vmem:[%s2350_s2 + $0x10] sm:$0xff] }
  0x3a   :  { %v749_v14 = vsel %vm747_vm5, %v748_v0, %v744_v6  ;;  %988 = vperm.xlu0 %1804, %v973_v60   ;;  %v174_v0 = vadd.s32 3, %v157_v63 }
  0x3b   :  { %v1762_v5 = vadd.s32 4294967294, %v136_v48  ;;  %v750_v15 = vadd.s32 %v749_v14, %v745_v7 }
  0x3d   :  { %vm1763_vm6 = vcmp.lt.s32.totalorder %v1762_v5, 0  ;;  %v751_v17 = vadd.s32 536870912, %v750_v15 }
  0x3e   :  { %v139_v10 = vsel %vm1763_vm6, 0, %v1762_v5  ;;  %vm173_vm6 = vweird.f32 %v1879_v2 }
  0x3f   :  { %v140_v18 = vsub.s32 32, %v139_v10  ;;  %v141_v8 = vshll.u32 %v132_v47, %v139_v10  ;;  %v144_v13 = vsub.s32 4294967266, %v139_v10  ;;  %v1999_v24 = vshrl.u32 %v751_v17, 30 }
  0x40   :  { %v175_v17 = vand.u32 3, %v174_v0 }
  0x41   :  { %v142_v62 = vshrl.u32 %v124_v11, %v140_v18  ;;  %v145_v16 = vadd.s32 127, %v144_v13  ;;  %v753_v20 = vshll.u32 %v1999_v24, 30  ;;  %v776_v6 = vsub.s32 4, %v1999_v24  ;;  %v1120_v18 = vld [vmem:[%s2352_s4 + $0x10] sm:$0xff] }
  0x42   :  { %1135 = vperm.xlu0 %1804, %v1120_v18   ;;  %vm180_vm13 = vcmp.eq.s32.totalorder %v175_v17, 2  ;;  %vm177_vm0 = vcmp.eq.s32.totalorder %v175_v17, 0  ;;  %vm176_vm2 = vcmp.lt.s32.totalorder %v175_v17, 2 }
  0x43   :  { %v143_v19 = vor.u32 %v142_v62, %v141_v8  ;;  %v146_v22 = vshll.u32 %v145_v16, 23  ;;  %v754_v25 = vsub.s32 %v750_v15, %v753_v20  ;;  %v971_v8 = vld [vmem:[%s2350_s2] sm:$0xff]  ;;  %v23_v15 = vlaneseq }
  0x44   :  { %978 = vperm.xlu1 %1805, %v971_v8   ;;  %v777_v62 = vsel %vm654_vm11, %v776_v6, %v1999_v24  ;;  %v1122_v24 = vld [vmem:[%s2352_s4 + $0x20] sm:$0xf] }
  0x45   :  { %v147_v12 = vor.u32 4788187, %v146_v22  ;;  %v150_v26 = vcvt.s32.f32 %v143_v19  ;;  %vm755_vm8 = vcmp.lt.s32.totalorder %v754_v25, 0  ;;  %v756_v30 = vsub.s32 0, %v754_v25 }
  0x46   :  { %v779_v20 = vsel %vm2027_vm12, 0, %v777_v62 }
  0x47   :  { %v148_v44 = vand.u32 2147483647, %v147_v12  ;;  %v757_v31 = vsel %vm755_vm8, %v756_v30, %v754_v25 }
  0x48   :  { %v758_v36 = vclz %v757_v31 }
  0x49   :  { %v151_v28 = vmul.f32 %v150_v26, %v148_v44  ;;  %v642_v26 = vand.u32 3, %v157_v63 }
  0x4a   :  { %v1774_v38 = vadd.s32 4294967294, %v758_v36  ;;  %v1121_v36 = vld [vmem:[%s2352_s4 + $0x18] sm:$0xff]  ;;  %1145 = vperm.xlu0 %1804, %v1122_v24  }
  0x4b   :  { %v152_v35 = vxor.u32 2147483648, %v151_v28  ;;  %vm647_vm14 = vcmp.eq.s32.totalorder %v642_v26, 2  ;;  %vm644_vm1 = vcmp.eq.s32.totalorder %v642_v26, 0  ;;  %vm643_vm3 = vcmp.lt.s32.totalorder %v642_v26, 2 }
  0x4c   :  { %vm1775_vm10 = vcmp.lt.s32.totalorder %v1774_v38, 0  ;;  %1140 = vperm.xlu1 %1805, %v1121_v36  }
  0x4d   :  { %v153_v21 = vsel %vm32_vm7, %v152_v35, %v151_v28  ;;  %v761_v33 = vsel %vm1775_vm10, 0, %v1774_v38  ;;  %v24_v28 = vshrl.u32 %v23_v15, 7 }
  0x4e   :  { %v156_v23 = vsel %vm2005_vm9, %v1879_v2, %v153_v21  ;;  %v762_v41 = vsub.s32 32, %v761_v33  ;;  %v763_v34 = vshll.u32 %v754_v25, %v761_v33  ;;  %v766_v42 = vsub.s32 4294967266, %v761_v33  ;;  %v966_v2 = vld [vmem:[%s2353_s1] sm:$0xff] }
  0x4f   :  { %v158_v55 = vmul.f32 %v156_v23, %v156_v23  ;;  %v796_v21 = vand.u32 3, %v779_v20  ;;  %vm795_vm9 = vweird.f32 %v1884_v3  ;;  %vm27_vm10 = vcmp.lt.s32.totalorder %v24_v28, 7 }
  0x50   :  { %v764_v45 = vshrl.u32 %v746_v39, %v762_v41  ;;  %v767_v46 = vadd.s32 127, %v766_v42 }
  0x51   :  { %v159_v40 = vmul.f32 -0.001358992, %v158_v55  ;;  %v166_v4 = vmul.f32 -0.00019511016, %v158_v55  ;;  %vm801_vm4 = vcmp.eq.s32.totalorder %v796_v21, 2  ;;  %vm798_vm5 = vcmp.eq.s32.totalorder %v796_v21, 0 }
  0x52   :  { %v765_v49 = vor.u32 %v764_v45, %v763_v34  ;;  %v768_v50 = vshll.u32 %v767_v46, 23  ;;  %v25_v34 = vadd.s32 8, %v24_v28  ;;  %vm797_vm7 = vcmp.lt.s32.totalorder %v796_v21, 2 }
  0x53   :  { %v167_v43 = vadd.f32 0.008332121, %v166_v4  ;;  %v160_v47 = vadd.f32 0.041655596, %v159_v40 }
  0x54   :  { %v769_v53 = vor.u32 4788187, %v768_v50  ;;  %v772_v54 = vcvt.s32.f32 %v765_v49  ;;  %vm496_vm8 = vcmp.lt.s32.totalorder %v25_v34, 14 }
  0x55   :  { %v168_v51 = vmul.f32 %v167_v43, %v158_v55  ;;  %v161_v56 = vmul.f32 %v160_v47, %v158_v55 }
  0x56   :  { %v770_v57 = vand.u32 2147483647, %v769_v53 }
  0x57   :  { %v169_v58 = vadd.f32 -0.16666654, %v168_v51  ;;  %v162_v48 = vadd.f32 -0.4999988, %v161_v56 }
  0x58   :  { %v773_v27 = vmul.f32 %v772_v54, %v770_v57 }
  0x59   :  { %v170_v1 = vmul.f32 %v169_v58, %v158_v55  ;;  %v163_v11 = vmul.f32 %v162_v48, %v158_v55  ;;  %v969_v58 = vld [vmem:[%s2353_s1 + $0x18] sm:$0xff] }
  0x5a   :  { %v774_v37 = vxor.u32 2147483648, %v773_v27 }
  0x5b   :  { %v171_v10 = vadd.f32 1.0, %v170_v1  ;;  %v164_v16 = vadd.f32 1.0, %v163_v11 }
  0x5c   :  { %v775_v5 = vsel %vm654_vm11, %v774_v37, %v773_v27  ;;  %vm1001_vm11 = vcmask 179200  }
  0x5d   :  { %v778_v7 = vsel %vm2027_vm12, %v1884_v3, %v775_v5  ;;  %v172_v12 = vmul.f32 %v171_v10, %v156_v23  ;;  %v181_v30 = vxor.u32 2147483648, %v164_v16 }
  0x5e   :  { %v780_v9 = vmul.f32 %v778_v7, %v778_v7 }
  0x5f   :  { %v178_v31 = vxor.u32 2147483648, %v172_v12  ;;  %v182_v38 = vsel %vm180_vm13, %v181_v30, %v172_v12  ;;  %v649_v39 = vsel %vm647_vm14, %v181_v30, %v172_v12 }
  0x60   :  { %v781_v13 = vmul.f32 -0.001358992, %v780_v9  ;;  %v788_v14 = vmul.f32 -0.00019511016, %v780_v9 }
  0x61   :  { %v179_v4 = vsel %vm177_vm0, %v164_v16, %v178_v31  ;;  %v646_v41 = vsel %vm644_vm1, %v164_v16, %v178_v31  ;;  %vm1148_vm1 = vcmask 261120  }
  0x62   :  { %v782_v19 = vadd.f32 0.041655596, %v781_v13  ;;  %v789_v22 = vadd.f32 0.008332121, %v788_v14  ;;  %v183_v45 = vsel %vm176_vm2, %v179_v4, %v182_v38  ;;  %v650_v46 = vsel %vm643_vm3, %v646_v41, %v649_v39  ;;  %v1118_v41 = vld [vmem:[%s2352_s4] sm:$0xff] }
  0x63   :  { %v184_v51 = vsel %vm173_vm6, nan, %v183_v45  ;;  %v651_v52 = vsel %vm173_vm6, nan, %v650_v46  ;;  %1125 = vperm.xlu2 %1806, %v1118_v41   ;;  %vm1749_vm2 = vcmask 523264  }
  0x64   :  { %v783_v44 = vmul.f32 %v782_v19, %v780_v9  ;;  %v790_v25 = vmul.f32 %v789_v22, %v780_v9  ;;  %v963_v57 = vsel %vm27_vm10, %v184_v51, %v651_v52 }
  0x66   :  { %v784_v32 = vadd.f32 -0.4999988, %v783_v44  ;;  %v791_v35 = vadd.f32 -0.16666654, %v790_v25 }
  0x68   :  { %v785_v23 = vmul.f32 %v784_v32, %v780_v9  ;;  %v792_v55 = vmul.f32 %v791_v35, %v780_v9 }
  0x6a   :  { %v786_v33 = vadd.f32 1.0, %v785_v23  ;;  %v793_v40 = vadd.f32 1.0, %v792_v55 }
  0x6c   :  { %v794_v42 = vmul.f32 %v793_v40, %v778_v7  ;;  %v802_v43 = vxor.u32 2147483648, %v786_v33 }
  0x6e   :  { %v799_v47 = vxor.u32 2147483648, %v794_v42  ;;  %v803_v49 = vsel %vm801_vm4, %v802_v43, %v794_v42 }
  0x70   :  { %v800_v50 = vsel %vm798_vm5, %v786_v33, %v799_v47 }
  0x71   :  { %v804_v53 = vsel %vm797_vm7, %v800_v50, %v803_v49 }
  0x72   :  { %v805_v54 = vsel %vm795_vm9, nan, %v804_v53 }
  0x73   :  { %v961_v56 = vsel %vm496_vm8, %v805_v54, %v1884_v3  ;;  %v967_v3 = vld [vmem:[%s2353_s1 + $0x8] sm:$0xff] }
  0x74   :  { %1035 = vmatpush.msra.mxu0 %v961_v56  ;;  %1791 = vmatpush.msra.mxu3 %v961_v56  ;;  %v994_v37 = vpop.permute.xlu0 %993 }
  0x76   :  { %1036 = vmatpush.msra.mxu0 %v963_v57  ;;  %1792 = vmatpush.msra.mxu3 %v963_v57 }
  0x77   :  { %1780 = vmatmul.msk.f32.vlgmr.msra.gmra.mxu0 %vm1001_vm11, %v966_v2  ;;  %1783 = vmatmul.msk.f32.vlgmr.msra.gmra.mxu3 %vm1001_vm11, %v969_v58  ;;  %v1119_v58 = vld [vmem:[%s2352_s4 + $0x8] sm:$0xff] }
  0x78   :  { %1130 = vperm.xlu2 %1806, %v1119_v58  }
  0x7f   :  { %1781 = vmatmul.msk.f32.gmra.mxu0 %vm1001_vm11, %v967_v3  ;;  %1784 = vmatmul.msk.f32.gmra.mxu3 %vm1001_vm11, %v970_v29 }
  0x87   :  { %1782 = vmatmul.msk.f32.gmra.mxu0 %vm1001_vm11, %v968_v59 }
  0xaa   :  { %v984_v60 = vpop.permute.xlu1 %983 }
  0xac   :  { %v989_v15 = vpop.permute.xlu0 %988 }
  0xb6   :  { %v979_v61 = vpop.permute.xlu1 %978 }
  0xf4   :  { %v1038_v27 = vpop.f32.mrf.mxu0 }
  0xf5   :  { %v2072_v48 = vadd.f32 %v1038_v27, %v979_v61 }
  0xf7   :  { %v1057_v1 = vand.u32 2147483647, %v2072_v48 }
  0xf9   :  { %v1061_v0 = vsub.f32 0.0, %v1057_v1 }
  0xfa   :  { %v1047_v63 = vpop.f32.mrf.mxu3 }
  0xfb   :  { %v1048_v5 = vadd.f32 %v1047_v63, %v994_v37  ;;  %v1065_v13 = vmul.f32 1.442695, %v1061_v0  ;;  %v1053_v37 = vmax.f32 %v2072_v48, 0.0  ;;  %v975_v48 = vld [vmem:[%s2350_s2 + $0x20] sm:$0x3f]  ;;  %v1115_v0 = vld [vmem:[%s2354_s3 + $0x10] sm:$0xff] }
  0xfc   :  { %v1041_v6 = vpop.f32.mrf.mxu0  ;;  %998 = vperm.xlu2 %1806, %v975_v48  }
  0xfd   :  { %v1060_v7 = vand.u32 2147483647, %v1048_v5  ;;  %v2078_v11 = vadd.f32 %v1041_v6, %v984_v60  ;;  %v1056_v23 = vmax.f32 %v1048_v5, 0.0  ;;  %v1113_v5 = vld [vmem:[%s2354_s3] sm:$0xff]  ;;  %v1116_v6 = vld [vmem:[%s2354_s3 + $0x18] sm:$0xff] }
  0xff   :  { %v1064_v9 = vsub.f32 0.0, %v1060_v7  ;;  %v1058_v10 = vand.u32 2147483647, %v2078_v11  ;;  %v1054_v61 = vmax.f32 %v2078_v11, 0.0  ;;  %v1114_v7 = vld [vmem:[%s2354_s3 + $0x8] sm:$0xff] }
 0x100   :  { %v1117_v11 = vld [vmem:[%s2354_s3 + $0x20] sm:$0xf] }
 0x101   :  { %v1071_v18 = vmul.f32 1.442695, %v1064_v9  ;;  %v1062_v8 = vsub.f32 0.0, %v1058_v10  ;;  %v1126_v9 = vpop.permute.xlu2 %1125 }
 0x103   :  { %1807 = vpow2.f32 %v1071_v18  ;;  %v1067_v14 = vmul.f32 1.442695, %v1062_v8  ;;  %v1141_v8 = vpop.permute.xlu1 %1140 }
 0x104   :  { %v1044_v62 = vpop.f32.mrf.mxu0 }
 0x105   :  { %1809 = vpow2.f32 %v1067_v14  ;;  %v1045_v16 = vadd.f32 %v1044_v62, %v989_v15 }
 0x106   :  { %1811 = vpow2.f32 %v1065_v13 }
 0x107   :  { %v1059_v17 = vand.u32 2147483647, %v1045_v16  ;;  %v1055_v2 = vmax.f32 %v1045_v16, 0.0 }
 0x109   :  { %v1808_v19 = vpop.eup %1807  ;;  %v1063_v22 = vsub.f32 0.0, %v1059_v17  ;;  %v1131_v15 = vpop.permute.xlu2 %1130 }
 0x10a   :  { %v1100_v12 = vadd.f32 1.0, %v1808_v19  ;;  %v1103_v44 = vmul.f32 -0.5, %v1808_v19  ;;  %v1106_v32 = vand.u32 2147483647, %v1808_v19 }
 0x10b   :  { %v1810_v26 = vpop.eup %1809  ;;  %v1069_v20 = vmul.f32 1.442695, %v1063_v22 }
 0x10c   :  { %1813 = vlog2.f32 %v1100_v12  ;;  %v1812_v25 = vpop.eup %1811  ;;  %v1082_v28 = vadd.f32 1.0, %v1810_v26  ;;  %v1104_v30 = vadd.f32 1.0, %v1103_v44  ;;  %vm1107_vm12 = vcmp.lt.f32.partialorder %v1106_v32, 0.0004427343 }
 0x10d   :  { %1815 = vpow2.f32 %v1069_v20  ;;  %v1073_v35 = vadd.f32 1.0, %v1812_v25  ;;  %v1085_v33 = vmul.f32 -0.5, %v1810_v26  ;;  %v1076_v4 = vmul.f32 -0.5, %v1812_v25 }
 0x10e   :  { %1817 = vlog2.f32 %v1082_v28  ;;  %v1105_v36 = vmul.f32 %v1808_v19, %v1104_v30  ;;  %v1088_v47 = vand.u32 2147483647, %v1810_v26  ;;  %v1079_v52 = vand.u32 2147483647, %v1812_v25 }
 0x10f   :  { %1819 = vlog2.f32 %v1073_v35  ;;  %v1086_v43 = vadd.f32 1.0, %v1085_v33  ;;  %v1077_v50 = vadd.f32 1.0, %v1076_v4 }
 0x110   :  { %vm1089_vm14 = vcmp.lt.f32.partialorder %v1088_v47, 0.0004427343  ;;  %vm1080_vm0 = vcmp.lt.f32.partialorder %v1079_v52, 0.0004427343 }
 0x111   :  { %v1087_v56 = vmul.f32 %v1810_v26, %v1086_v43  ;;  %v1078_v60 = vmul.f32 %v1812_v25, %v1077_v50  ;;  %v1136_v26 = vpop.permute.xlu0 %1135 }
 0x112   :  { %v1814_v31 = vpop.eup %1813 }
 0x113   :  { %v1816_v21 = vpop.eup %1815  ;;  %v1102_v24 = vmul.f32 0.6931472, %v1814_v31 }
 0x114   :  { %v1091_v55 = vadd.f32 1.0, %v1816_v21  ;;  %v1094_v39 = vmul.f32 -0.5, %v1816_v21  ;;  %v1818_v34 = vpop.eup %1817  ;;  %v1097_v46 = vand.u32 2147483647, %v1816_v21 }
 0x115   :  { %v1108_v38 = vsel %vm1107_vm12, %v1105_v36, %v1102_v24  ;;  %v1820_v45 = vpop.eup %1819  ;;  %v1084_v49 = vmul.f32 0.6931472, %v1818_v34 }
 0x116   :  { %v1112_v40 = vadd.f32 %v1108_v38, %v1056_v23  ;;  %1821 = vlog2.f32 %v1091_v55  ;;  %v1095_v42 = vadd.f32 1.0, %v1094_v39  ;;  %v1075_v57 = vmul.f32 0.6931472, %v1820_v45 }
 0x117   :  { %vm1098_vm13 = vcmp.lt.f32.partialorder %v1097_v46, 0.0004427343  ;;  %v1090_v59 = vsel %vm1089_vm14, %v1087_v56, %v1084_v49 }
 0x118   :  { %1176 = vmatpush.msra.mxu1 %v1112_v40  ;;  %1793 = vmatpush.msra.mxu2 %v1112_v40  ;;  %v1096_v54 = vmul.f32 %v1816_v21, %v1095_v42  ;;  %v1081_v29 = vsel %vm1080_vm0, %v1078_v60, %v1075_v57  ;;  %v1110_v63 = vadd.f32 %v1090_v59, %v1054_v61  ;;  %v1050_v60 = vpop.f32.mrf.mxu3 }
 0x119   :  { %v1109_v1 = vadd.f32 %v1081_v29, %v1053_v37 }
 0x11c   :  { %v1822_v51 = vpop.eup %1821 }
 0x11d   :  { %v1093_v53 = vmul.f32 0.6931472, %v1822_v51 }
 0x11f   :  { %v1099_v3 = vsel %vm1098_vm13, %v1096_v54, %v1093_v53 }
 0x120   :  { %v1111_v27 = vadd.f32 %v1099_v3, %v1055_v2 }
 0x122   :  { %1177 = vmatpush.msra.mxu1 %v1111_v27  ;;  %1794 = vmatpush.msra.mxu2 %v1111_v27 }
 0x124   :  { %1178 = vmatpush.msra.mxu1 %v1110_v63  ;;  %1795 = vmatpush.msra.mxu2 %v1110_v63 }
 0x126   :  { %1179 = vmatpush.msra.mxu1 %v1109_v1  ;;  %1796 = vmatpush.msra.mxu2 %v1109_v1 }
 0x127   :  { %1785 = vmatmul.msk.f32.vlgmr.msra.gmra.mxu1 %vm1148_vm1, %v1113_v5  ;;  %1788 = vmatmul.msk.f32.vlgmr.msra.gmra.mxu2 %vm1148_vm1, %v1116_v6 }
 0x12f   :  { %1786 = vmatmul.msk.f32.gmra.mxu1 %vm1148_vm1, %v1114_v7  ;;  %1789 = vmatmul.msk.f32.gmra.mxu2 %vm1148_vm1, %v1117_v11 }
 0x137   :  { %1787 = vmatmul.msk.f32.gmra.mxu1 %vm1148_vm1, %v1115_v0 }
 0x156   :  { %v999_v59 = vpop.permute.xlu2 %998 }
 0x157   :  { %v2159_v27 = vadd.f32 %v1050_v60, %v999_v59 }
 0x1a4   :  { %v1181_v10 = vpop.f32.mrf.mxu1 }
 0x1a5   :  { %v1182_v18 = vadd.f32 %v1181_v10, %v1126_v9 }
 0x1a7   :  { %1823 = vrsqrt.f32 %v1182_v18  ;;  %1750 = vst.msk [vmem:[%s2355_s5] sm:$0xff] %vm1749_vm2, %v1182_v18  ;;  %vm1202_vm4 = vweird.f32 %v1182_v18 }
 0x1aa   :  { %v1190_v13 = vpop.f32.mrf.mxu2 }
 0x1ab   :  { %v2111_v14 = vadd.f32 %v1190_v13, %v1141_v8 }
 0x1ac   :  { %v1184_v62 = vpop.f32.mrf.mxu1 }
 0x1ad   :  { %v1824_v16 = vpop.eup %1823  ;;  %v1185_v17 = vadd.f32 %v1184_v62, %v1131_v15  ;;  %1753 = vst.msk [vmem:[%s2355_s5 + $0x18] sm:$0xff] %vm1749_vm2, %v2111_v14 }
 0x1ae   :  { %v1197_v19 = vmul.f32 %v1824_v16, %v1182_v18  ;;  %vm1203_vm3 = vweird.f32 %v1824_v16 }
 0x1af   :  { %1751 = vst.msk [vmem:[%s2355_s5 + $0x8] sm:$0xff] %vm1749_vm2, %v1185_v17  ;;  %vm1204_vm5 = vmor %vm1202_vm4, %vm1203_vm3 }
 0x1b0   :  { %v1198_v22 = vmul.f32 %v1824_v16, %v1197_v19 }
 0x1b2   :  { %v1199_v12 = vmul.f32 0.5, %v1198_v22 }
 0x1b4   :  { %v1200_v20 = vsub.f32 1.5, %v1199_v12  ;;  %v1187_v44 = vpop.f32.mrf.mxu1 }
 0x1b5   :  { %v2122_v25 = vadd.f32 %v1187_v44, %v1136_v26 }
 0x1b6   :  { %v1201_v28 = vmul.f32 %v1824_v16, %v1200_v20 }
 0x1b7   :  { %1752 = vst.msk [vmem:[%s2355_s5 + $0x10] sm:$0xff] %vm1749_vm2, %v2122_v25 }
 0x1b8   :  { %v2129_v30 = vsel %vm1204_vm5, %v1824_v16, %v1201_v28 }
 0x1b9   :  { %v1207_v32 = vrot.slane %v2129_v30, 2  ;;  %v1225_v23 = vrot.slane %v2129_v30, 4  ;;  %v1260_v52 = vrot.slane %v2129_v30, 6  ;;  %v2165_v1 = vmul.f32 %v2129_v30, %v2159_v27 }
 0x1ba   :  { %v2177_v15 = vmul.f32 %v2129_v30, %v2111_v14 }
 0x1bb   :  { %v2132_v35 = vmul.f32 %v1207_v32, %v1182_v18  ;;  %v2135_v31 = vmul.f32 %v1207_v32, %v2111_v14  ;;  %v2141_v33 = vmul.f32 %v1225_v23, %v1185_v17  ;;  %v2156_v2 = vmul.f32 %v1260_v52, %v2122_v25 }
 0x1bc   :  { %v1525_v9 = vrot.slane %v2165_v1, 2 }
 0x1bd   :  { %v1210_v21 = vmul.f32 %v2132_v35, %v2132_v35  ;;  %v1229_v38 = vrot.slane %v2132_v35, 2  ;;  %v1240_v45 = vmul.f32 %v2141_v33, %v2141_v33  ;;  %v1263_v54 = vrot.slane %v2132_v35, 4 }
 0x1be   :  { %v1274_v37 = vrot.slane %v2141_v33, 2  ;;  %v1319_v8 = vrot.slane %v2132_v35, 6  ;;  %v1527_v16 = vmul.f32 %v1525_v9, %v2132_v35  ;;  %v1293_v12 = vmul.f32 %v2156_v2, %v2156_v2 }
 0x1bf   :  { %v1212_v24 = vrot.slane %v1210_v21, 7  ;;  %v1231_v4 = vmul.f32 %v1229_v38, %v2141_v33  ;;  %v1242_v51 = vrot.slane %v1240_v45, 6  ;;  %v1265_v3 = vmul.f32 %v1263_v54, %v2156_v2 }
 0x1c0   :  { %v1276_v11 = vmul.f32 %v1274_v37, %v2156_v2  ;;  %v1321_v22 = vmul.f32 %v1319_v8, %v2177_v15  ;;  %v1529_v28 = vrot.slane %v1527_v16, 5  ;;  %v1329_v23 = vrot.slane %v2141_v33, 4 }
 0x1c1   :  { %v1214_v36 = vsub.f32 %v1182_v18, %v1212_v24  ;;  %v1233_v42 = vrot.slane %v1231_v4, 7  ;;  %v1244_v56 = vsub.f32 %v1185_v17, %v1242_v51  ;;  %v1267_v61 = vrot.slane %v1265_v3, 7 }
 0x1c2   :  { %v1278_v13 = vrot.slane %v1276_v11, 6  ;;  %v1323_v24 = vrot.slane %v1321_v22, 7  ;;  %v1347_v59 = vrot.slane %v2156_v2, 2 }
 0x1c3   :  { %1825 = vrsqrt.f32 %v1214_v36  ;;  %vm1221_vm7 = vweird.f32 %v1214_v36  ;;  %v1235_v47 = vsub.f32 %v1185_v17, %v1233_v42  ;;  %v1269_v5 = vsub.f32 %v2122_v25, %v1267_v61 }
 0x1c4   :  { %v1280_v26 = vsub.f32 %v2122_v25, %v1278_v13  ;;  %v1325_v4 = vsub.f32 %v2111_v14, %v1323_v24  ;;  %v1349_v11 = vmul.f32 %v1347_v59, %v2177_v15 }
 0x1c9   :  { %v1826_v55 = vpop.eup %1825 }
 0x1ca   :  { %v1216_v39 = vmul.f32 %v1826_v55, %v1214_v36  ;;  %vm1222_vm6 = vweird.f32 %v1826_v55  ;;  %v1295_v36 = vrot.slane %v1293_v12, 5  ;;  %v1351_v12 = vrot.slane %v1349_v11, 5 }
 0x1cb   :  { %vm1223_vm8 = vmor %vm1221_vm7, %vm1222_vm6  ;;  %vm1747_vm7 = vcmask 1040384  }
 0x1cc   :  { %v1217_v40 = vmul.f32 %v1826_v55, %v1216_v39 }
 0x1ce   :  { %v1218_v41 = vmul.f32 0.5, %v1217_v40  ;;  %v1531_v40 = vsub.f32 %v2159_v27, %v1529_v28 }
 0x1d0   :  { %v1219_v34 = vsub.f32 1.5, %v1218_v41 }
 0x1d2   :  { %v1220_v43 = vmul.f32 %v1826_v55, %v1219_v34  ;;  %v1297_v34 = vsub.f32 %v2122_v25, %v1295_v36 }
 0x1d4   :  { %v2146_v46 = vsel %vm1223_vm8, %v1826_v55, %v1220_v43  ;;  %v1331_v43 = vmul.f32 %v1329_v23, %v2177_v15  ;;  %vm1755_vm8 = vcmask 517120  }
 0x1d5   :  { %v1237_v49 = vrot.slane %v2146_v46, 2  ;;  %v1270_v29 = vrot.slane %v2146_v46, 4  ;;  %v2195_v38 = vrot.slane %v2146_v46, 6 }
 0x1d7   :  { %v2149_v50 = vmul.f32 %v1237_v49, %v1235_v47  ;;  %v2169_v7 = vmul.f32 %v1270_v29, %v1269_v5  ;;  %v2205_v45 = vmul.f32 %v2195_v38, %v1325_v4  ;;  %v2208_v47 = vmul.f32 %v1531_v40, %v2195_v38 }
 0x1d8   :  { %v1549_v4 = vrot.slane %v2165_v1, 6 }
 0x1d9   :  { %v1245_v53 = vmul.f32 %v2149_v50, %v2149_v50  ;;  %v1282_v6 = vrot.slane %v2149_v50, 2  ;;  %v1298_v44 = vmul.f32 %v2169_v7, %v2169_v7  ;;  %v1336_v41 = vrot.slane %v2149_v50, 4 }
 0x1da   :  { %v1541_v25 = vrot.slane %v2208_v47, 4  ;;  %v1355_v37 = vrot.slane %v2169_v7, 2  ;;  %v1418_v22 = vrot.slane %v2149_v50, 6  ;;  %v1379_v23 = vmul.f32 %v2205_v45, %v2205_v45 }
 0x1db   :  { %v1247_v57 = vrot.slane %v1245_v53, 7  ;;  %v1284_v10 = vmul.f32 %v1282_v6, %v2169_v7  ;;  %v1300_v39 = vrot.slane %v1298_v44, 6  ;;  %v1338_v52 = vmul.f32 %v1336_v41, %v2205_v45 }
 0x1dc   :  { %v1533_v53 = vrot.slane %v2165_v1, 4  ;;  %v1543_v29 = vmul.f32 %v1541_v25, %v2149_v50  ;;  %v1374_v44 = vmul.f32 %v2177_v15, %v2177_v15  ;;  %v1551_v59 = vmul.f32 %v1549_v4, %v2156_v2 }
 0x1dd   :  { %v1249_v58 = vsub.f32 %v1244_v56, %v1247_v57  ;;  %v1286_v17 = vrot.slane %v1284_v10, 7  ;;  %v1302_v49 = vsub.f32 %v1297_v34, %v1300_v39  ;;  %v1333_v56 = vrot.slane %v1331_v43, 6  ;;  %v1193_v39 = vpop.f32.mrf.mxu2 }
 0x1de   :  { %v1405_v57 = vmul.f32 %v2135_v31, %v2132_v35  ;;  %v1535_v3 = vmul.f32 %v1533_v53, %v2141_v33  ;;  %v1411_v10 = vrot.slane %v2141_v33, 6  ;;  %v1545_v13 = vrot.slane %v1543_v29, 3 }
 0x1df   :  { %1827 = vrsqrt.f32 %v1249_v58  ;;  %vm1256_vm10 = vweird.f32 %v1249_v58  ;;  %v1288_v32 = vsub.f32 %v1280_v26, %v1286_v17  ;;  %v1335_v60 = vsub.f32 %v2111_v14, %v1333_v56 }
 0x1e0   :  { %v1413_v28 = vmul.f32 %v1411_v10, %v2135_v31  ;;  %v1556_v10 = vrot.slane %v2208_v47, 6 }
 0x1e5   :  { %v1828_v63 = vpop.eup %1827 }
 0x1e6   :  { %v1251_v48 = vmul.f32 %v1828_v63, %v1249_v58  ;;  %vm1257_vm9 = vweird.f32 %v1828_v63  ;;  %v1340_v58 = vrot.slane %v1338_v52, 7 }
 0x1e7   :  { %vm1258_vm11 = vmor %vm1256_vm10, %vm1257_vm9  ;;  %vm1740_vm9 = vcmask 1043456   ;;  %vm1742_vm10 = vcmask 1044480  }
 0x1e8   :  { %v1252_v0 = vmul.f32 %v1828_v63, %v1251_v48  ;;  %v1342_v6 = vsub.f32 %v1335_v60, %v1340_v58  ;;  %v1537_v48 = vrot.slane %v1535_v3, 2  ;;  %v1428_v3 = vrot.slane %v2156_v2, 4 }
 0x1ea   :  { %v1253_v18 = vmul.f32 0.5, %v1252_v0 }
 0x1ec   :  { %v1254_v62 = vsub.f32 1.5, %v1253_v18 }
 0x1ee   :  { %v1255_v19 = vmul.f32 %v1828_v63, %v1254_v62  ;;  %v1357_v62 = vmul.f32 %v1355_v37, %v2205_v45 }
 0x1f0   :  { %v2186_v20 = vsel %vm1258_vm11, %v1828_v63, %v1255_v19  ;;  %v1407_v63 = vrot.slane %v1405_v57, 7  ;;  %v1539_v19 = vsub.f32 %v2159_v27, %v1537_v48  ;;  %v1359_v36 = vrot.slane %v1357_v62, 6 }
 0x1f1   :  { %v1290_v21 = vrot.slane %v2186_v20, 2  ;;  %v2219_v61 = vrot.slane %v2186_v20, 4  ;;  %v1381_v57 = vrot.slane %v1379_v23, 5  ;;  %v1435_v48 = vrot.slane %v2169_v7, 4 }
 0x1f2   :  { %v1409_v16 = vsub.f32 %v2111_v14, %v1407_v63  ;;  %v1547_v24 = vsub.f32 %v1539_v19, %v1545_v13  ;;  %v1430_v13 = vmul.f32 %v1428_v3, %v2135_v31  ;;  %v1553_v62 = vrot.slane %v1551_v59, 7 }
 0x1f3   :  { %v2192_v55 = vmul.f32 %v1290_v21, %v1288_v32  ;;  %v2227_v8 = vmul.f32 %v2219_v61, %v1342_v6  ;;  %vm1745_vm11 = vcmask 1046528  }
 0x1f4   :  { %v2238_v21 = vmul.f32 %v1409_v16, %v2146_v46  ;;  %v2244_v41 = vmul.f32 %v1547_v24, %v2219_v61  ;;  %v1146_v46 = vpop.permute.xlu0 %1145 }
 0x1f5   :  { %v1303_v42 = vmul.f32 %v2192_v55, %v2192_v55  ;;  %v1363_v0 = vrot.slane %v2192_v55, 2  ;;  %v1384_v53 = vmul.f32 %v2227_v8, %v2227_v8  ;;  %v2250_v56 = vadd.f32 %v1193_v39, %v1146_v46 }
 0x1f6   :  { %v1420_v34 = vmul.f32 %v1418_v22, %v2238_v21  ;;  %v1561_v63 = vrot.slane %v2244_v41, 6  ;;  %v1437_v22 = vmul.f32 %v1435_v48, %v2238_v21  ;;  %v1453_v39 = vrot.slane %v2177_v15, 2 }
 0x1f7   :  { %v1305_v51 = vrot.slane %v1303_v42, 7  ;;  %v1365_v26 = vmul.f32 %v1363_v0, %v2227_v8  ;;  %v1353_v42 = vsub.f32 %v2111_v14, %v1351_v12  ;;  %v1386_v11 = vrot.slane %v1384_v53, 6 }
 0x1f8   :  { %v1422_v60 = vrot.slane %v1420_v34, 7  ;;  %v1425_v0 = vrot.slane %v2186_v20, 6  ;;  %v1563_v19 = vmul.f32 %v1561_v63, %v2192_v55  ;;  %v1569_v34 = vmul.f32 %v2165_v1, %v2177_v15 }
 0x1f9   :  { %v1307_v54 = vsub.f32 %v1302_v49, %v1305_v51  ;;  %v1367_v43 = vrot.slane %v1365_v26, 7  ;;  %v1376_v49 = vrot.slane %v1374_v44, 4  ;;  %v1415_v51 = vrot.slane %v1413_v28, 6 }
 0x1fa   :  { %v1361_v25 = vsub.f32 %v1353_v42, %v1359_v36  ;;  %v1558_v44 = vmul.f32 %v1556_v10, %v2169_v7  ;;  %v1432_v28 = vrot.slane %v1430_v13, 5  ;;  %v1555_v36 = vsub.f32 %v2159_v27, %v1553_v62 }
 0x1fb   :  { %1829 = vrsqrt.f32 %v1307_v54  ;;  %vm1314_vm13 = vweird.f32 %v1307_v54  ;;  %v1417_v6 = vsub.f32 %v2250_v56, %v1415_v51  ;;  %v1565_v23 = vrot.slane %v1563_v19, 1 }
 0x1fc   :  { %v1369_v29 = vsub.f32 %v1361_v25, %v1367_v43  ;;  %v1559_v4 = vsub.f32 %v1555_v36, %v1558_v44  ;;  %v1461_v42 = vrot.slane %v2205_v45, 2  ;;  %v1434_v43 = vsub.f32 %v2250_v56, %v1432_v28 }
 0x1fd   :  { %v1424_v16 = vsub.f32 %v1417_v6, %v1422_v60  ;;  %v1574_v51 = vmul.f32 %v2208_v47, %v2205_v45  ;;  %v1469_v53 = vrot.slane %v2227_v8, 2  ;;  %v1571_v59 = vrot.slane %v1569_v34, 4 }
 0x1fe   :  { %v1590_v60 = vmul.f32 %v1525_v9, %v2135_v31  ;;  %v1579_v63 = vmul.f32 %v2244_v41, %v2227_v8  ;;  %v1493_v28 = vmul.f32 %v2238_v21, %v2238_v21 }
 0x1ff   :  { %v2271_v12 = vmul.f32 %v1425_v0, %v1424_v16  ;;  %v1576_v10 = vrot.slane %v1574_v51, 5  ;;  %v1573_v62 = vsub.f32 %v2159_v27, %v1571_v59 }
 0x200   :  { %v1592_v16 = vrot.slane %v1590_v60, 1  ;;  %v1581_v19 = vrot.slane %v1579_v63, 6 }
 0x201   :  { %v1830_v5 = vpop.eup %1829 }
 0x202   :  { %v1309_v18 = vmul.f32 %v1830_v5, %v1307_v54  ;;  %vm1315_vm12 = vweird.f32 %v1830_v5  ;;  %v1378_v54 = vsub.f32 %v2111_v14, %v1376_v49  ;;  %v1567_v49 = vsub.f32 %v1559_v4, %v1565_v23 }
 0x203   :  { %vm1316_vm14 = vmor %vm1314_vm13, %vm1315_vm12  ;;  %v1578_v23 = vsub.f32 %v1573_v62, %v1576_v10 }
 0x204   :  { %v1310_v17 = vmul.f32 %v1830_v5, %v1309_v18  ;;  %v1383_v18 = vsub.f32 %v1378_v54, %v1381_v57  ;;  %v1463_v54 = vmul.f32 %v1461_v42, %v2238_v21  ;;  %v1498_v42 = vmul.f32 %v2271_v12, %v2271_v12 }
 0x206   :  { %v1311_v32 = vmul.f32 0.5, %v1310_v17  ;;  %v1442_v17 = vrot.slane %v2192_v55, 4  ;;  %v1388_v20 = vsub.f32 %v1383_v18, %v1386_v11  ;;  %v1595_v11 = vrot.slane %v2208_v47, 2 }
 0x207   :  { %v1471_v18 = vmul.f32 %v1469_v53, %v2271_v12  ;;  %v1495_v53 = vrot.slane %v1493_v28, 4 }
 0x208   :  { %v1312_v40 = vsub.f32 1.5, %v1311_v32  ;;  %v1444_v24 = vmul.f32 %v1442_v17, %v2271_v12 }
 0x20a   :  { %v1313_v52 = vmul.f32 %v1830_v5, %v1312_v40  ;;  %v1439_v40 = vrot.slane %v1437_v22, 6  ;;  %v1446_v46 = vrot.slane %v1444_v24, 7  ;;  %v1465_v22 = vrot.slane %v1463_v54, 5 }
 0x20b   :  { %v1597_v24 = vmul.f32 %v1595_v11, %v2238_v21  ;;  %v1594_v11 = vsub.f32 %v2159_v27, %v1592_v16 }
 0x20c   :  { %v1317_v58 = vsel %vm1316_vm14, %v1830_v5, %v1313_v52  ;;  %v1455_v52 = vmul.f32 %v1453_v39, %v2135_v31  ;;  %v1441_v25 = vsub.f32 %v1434_v43, %v1439_v40  ;;  %v1473_v39 = vrot.slane %v1471_v18, 6 }
 0x20d   :  { %v2254_v37 = vrot.slane %v1317_v58, 2  ;;  %v1449_v57 = vrot.slane %v1317_v58, 4 }
 0x20e   :  { %v1448_v6 = vsub.f32 %v1441_v25, %v1446_v46  ;;  %v1457_v58 = vrot.slane %v1455_v52, 4  ;;  %v1583_v46 = vsub.f32 %v1578_v23, %v1581_v19  ;;  %v1599_v25 = vrot.slane %v1597_v24, 2 }
 0x20f   :  { %v2262_v5 = vmul.f32 %v2254_v37, %v1369_v29  ;;  %v2286_v3 = vmul.f32 %v1567_v49, %v2254_v37 }
 0x210   :  { %v2297_v13 = vmul.f32 %v1449_v57, %v1448_v6  ;;  %v1459_v44 = vsub.f32 %v2250_v56, %v1457_v58 }
 0x211   :  { %v1389_v14 = vmul.f32 %v2262_v5, %v2262_v5  ;;  %v1477_v48 = vrot.slane %v2262_v5, 2  ;;  %v1584_v9 = vmul.f32 %v2286_v3, %v2262_v5  ;;  %v1610_v4 = vrot.slane %v2286_v3, 2 }
 0x212   :  { %v1467_v49 = vsub.f32 %v1459_v44, %v1465_v22  ;;  %v1503_v60 = vmul.f32 %v2297_v13, %v2297_v13 }
 0x213   :  { %v1391_v26 = vrot.slane %v1389_v14, 7  ;;  %v1488_v14 = vmul.f32 %v2135_v31, %v2135_v31  ;;  %v1586_v40 = vrot.slane %v1584_v9, 7  ;;  %v1612_v54 = vmul.f32 %v1610_v4, %v2297_v13 }
 0x214   :  { %v1475_v59 = vsub.f32 %v1467_v49, %v1473_v39 }
 0x215   :  { %v1393_v32 = vsub.f32 %v1388_v20, %v1391_v26  ;;  %v1602_v20 = vrot.slane %v2244_v41, 2  ;;  %v1479_v26 = vmul.f32 %v1477_v48, %v2297_v13  ;;  %v1490_v34 = vrot.slane %v1488_v14, 3 }
 0x216   :  { %v1588_v63 = vsub.f32 %v1583_v46, %v1586_v40  ;;  %v1500_v48 = vrot.slane %v1498_v42, 5  ;;  %v1614_v19 = vrot.slane %v1612_v54, 4 }
 0x217   :  { %1831 = vrsqrt.f32 %v1393_v32  ;;  %v1604_v51 = vmul.f32 %v1602_v20, %v2271_v12  ;;  %v1481_v52 = vrot.slane %v1479_v26, 7  ;;  %vm1400_vm1 = vweird.f32 %v1393_v32 }
 0x218   :  { %v1492_v6 = vsub.f32 %v2250_v56, %v1490_v34 }
 0x219   :  { %v1483_v10 = vsub.f32 %v1475_v59, %v1481_v52 }
 0x21a   :  { %v1497_v62 = vsub.f32 %v1492_v6, %v1495_v53 }
 0x21c   :  { %v1502_v20 = vsub.f32 %v1497_v62, %v1500_v48 }
 0x21d   :  { %v1832_v29 = vpop.eup %1831 }
 0x21e   :  { %v1395_v0 = vmul.f32 %v1832_v29, %v1393_v32  ;;  %vm1401_vm0 = vweird.f32 %v1832_v29  ;;  %v1601_v32 = vsub.f32 %v1594_v11, %v1599_v25 }
 0x21f   :  { %vm1402_vm3 = vmor %vm1400_vm1, %vm1401_vm0 }
 0x220   :  { %v1396_v17 = vmul.f32 %v1832_v29, %v1395_v0  ;;  %v1606_v0 = vrot.slane %v1604_v51, 3 }
 0x222   :  { %v1397_v36 = vmul.f32 0.5, %v1396_v17  ;;  %v1505_v17 = vrot.slane %v1503_v60, 6  ;;  %v1608_v26 = vsub.f32 %v1601_v32, %v1606_v0 }
 0x224   :  { %v1398_v43 = vsub.f32 1.5, %v1397_v36  ;;  %v1507_v24 = vsub.f32 %v1502_v20, %v1505_v17  ;;  %v1616_v23 = vsub.f32 %v1608_v26, %v1614_v19 }
 0x226   :  { %v1399_v57 = vmul.f32 %v1832_v29, %v1398_v43 }
 0x228   :  { %v1403_v58 = vsel %vm1402_vm3, %v1832_v29, %v1399_v57 }
 0x229   :  { %v1485_v18 = vrot.slane %v1403_v58, 2  ;;  %v1589_v9 = vmul.f32 %v1588_v63, %v1403_v58 }
 0x22b   :  { %v1487_v14 = vmul.f32 %v1485_v18, %v1483_v10  ;;  %v1618_v22 = vrot.slane %v1589_v9, 2 }
 0x22d   :  { %v1508_v44 = vmul.f32 %v1487_v14, %v1487_v14  ;;  %v1620_v28 = vmul.f32 %v1618_v22, %v1487_v14 }
 0x22f   :  { %v1510_v36 = vrot.slane %v1508_v44, 7  ;;  %v1622_v39 = vrot.slane %v1620_v28, 5 }
 0x231   :  { %v1512_v27 = vsub.f32 %v1507_v24, %v1510_v36  ;;  %v1624_v29 = vsub.f32 %v1616_v23, %v1622_v39 }
 0x233   :  { %1833 = vrsqrt.f32 %v1512_v27  ;;  %vm1519_vm5 = vweird.f32 %v1512_v27 }
 0x239   :  { %v1834_v16 = vpop.eup %1833 }
 0x23a   :  { %v1514_v40 = vmul.f32 %v1834_v16, %v1512_v27  ;;  %vm1520_vm4 = vweird.f32 %v1834_v16 }
 0x23b   :  { %vm1521_vm6 = vmor %vm1519_vm5, %vm1520_vm4 }
 0x23c   :  { %v1515_v4 = vmul.f32 %v1834_v16, %v1514_v40 }
 0x23e   :  { %v1516_v34 = vmul.f32 0.5, %v1515_v4 }
 0x240   :  { %v1517_v42 = vsub.f32 1.5, %v1516_v34 }
 0x242   :  { %v1518_v43 = vmul.f32 %v1834_v16, %v1517_v42 }
 0x244   :  { %v1522_v46 = vsel %vm1521_vm6, %v1834_v16, %v1518_v43 }
 0x245   :  { %v1626_v49 = vrot.slane %v1522_v46, 6 }
 0x247   :  { %v1628_v51 = vmul.f32 %v1626_v49, %v1624_v29 }
 0x249   :  { %v1629_v52 = vmul.f32 %v1628_v51, %v1626_v49 }
 0x24b   :  { %v1631_v53 = vrot.slane %v1629_v52, 3  ;;  %v1644_v25 = vrot.slane %v1629_v52, 4  ;;  %v1689_v36 = vrot.slane %v1629_v52, 6  ;;  %v1723_v46 = vrot.slane %v1629_v52, 7 }
 0x24d   :  { %v1633_v57 = vmul.f32 %v1631_v53, %v1487_v14  ;;  %v1646_v59 = vmul.f32 %v1644_v25, %v2297_v13  ;;  %v1725_v53 = vmul.f32 %v1723_v46, %v2135_v31 }
 0x24f   :  { %v1635_v60 = vrot.slane %v1633_v57, 6  ;;  %v1648_v18 = vrot.slane %v1646_v59, 6  ;;  %v1727_v59 = vrot.slane %v1725_v53, 6 }
 0x251   :  { %v1637_v63 = vsub.f32 %v1589_v9, %v1635_v60  ;;  %v1664_v9 = vrot.slane %v1629_v52, 5 }
 0x253   :  { %v1638_v54 = vmul.f32 %v1637_v63, %v1403_v58  ;;  %v1666_v19 = vmul.f32 %v1664_v9, %v2271_v12 }
 0x255   :  { %v1640_v6 = vrot.slane %v1638_v54, 1  ;;  %v1719_v48 = vrot.slane %v1638_v54, 4  ;;  %v1660_v14 = vrot.slane %v1638_v54, 2  ;;  %v1668_v20 = vrot.slane %v1666_v19, 6 }
 0x256   :  { %v1685_v23 = vrot.slane %v1638_v54, 3 }
 0x257   :  { %v1642_v11 = vmul.f32 %v1640_v6, %v2262_v5  ;;  %v1748_v0 = vsel %vm1747_vm7, %v1719_v48, %v1644_v25 }
 0x258   :  { %1756 = vst.msk [vmem:[%s2355_s5 + $0x28] sm:$0x3] %vm1755_vm8, %v1748_v0 }
 0x259   :  { %v1643_v10 = vsub.f32 %v2286_v3, %v1642_v11  ;;  %v1662_v3 = vmul.f32 %v1660_v14, %v2227_v8  ;;  %v1687_v8 = vmul.f32 %v1685_v23, %v2205_v45 }
 0x25b   :  { %v1650_v62 = vsub.f32 %v1643_v10, %v1648_v18 }
 0x25d   :  { %v1651_v13 = vmul.f32 %v1650_v62, %v2254_v37 }
 0x25f   :  { %v1653_v32 = vrot.slane %v1651_v13, 7  ;;  %v1680_v24 = vmul.f32 %v1651_v13, %v2169_v7  ;;  %v1712_v34 = vrot.slane %v1651_v13, 1  ;;  %v1738_v63 = vrot.slane %v1651_v13, 4 }
 0x261   :  { %v1655_v58 = vmul.f32 %v1653_v32, %v2192_v55  ;;  %v1682_v12 = vrot.slane %v1680_v24, 2 }
 0x263   :  { %v1657_v17 = vrot.slane %v1655_v58, 2 }
 0x265   :  { %v1659_v5 = vsub.f32 %v2244_v41, %v1657_v17  ;;  %v1691_v41 = vmul.f32 %v1689_v36, %v2238_v21 }
 0x267   :  { %v1663_v22 = vsub.f32 %v1659_v5, %v1662_v3  ;;  %v1693_v16 = vrot.slane %v1691_v41, 6 }
 0x269   :  { %v1670_v26 = vsub.f32 %v1663_v22, %v1668_v20 }
 0x26b   :  { %v1671_v44 = vmul.f32 %v1670_v26, %v2219_v61 }
 0x26d   :  { %v1673_v28 = vrot.slane %v1671_v44, 5  ;;  %v1705_v4 = vrot.slane %v1671_v44, 6  ;;  %v1736_v52 = vrot.slane %v1671_v44, 4 }
 0x26f   :  { %v1675_v37 = vmul.f32 %v1673_v28, %v2149_v50  ;;  %v1707_v42 = vmul.f32 %v1705_v4, %v2141_v33 }
 0x271   :  { %v1677_v55 = vrot.slane %v1675_v37, 4  ;;  %v1709_v49 = vrot.slane %v1707_v42, 4 }
 0x273   :  { %v1679_v39 = vsub.f32 %v2208_v47, %v1677_v55  ;;  %v1714_v47 = vmul.f32 %v1712_v34, %v2156_v2 }
 0x275   :  { %v1684_v27 = vsub.f32 %v1679_v39, %v1682_v12  ;;  %v1716_v51 = vrot.slane %v1714_v47, 2 }
 0x277   :  { %v1688_v29 = vsub.f32 %v1684_v27, %v1687_v8 }
 0x279   :  { %v1695_v40 = vsub.f32 %v1688_v29, %v1693_v16 }
 0x27b   :  { %v1696_v61 = vmul.f32 %v1695_v40, %v2195_v38  ;;  %v1721_v38 = vmul.f32 %v1719_v48, %v2177_v15 }
 0x27d   :  { %v1698_v50 = vrot.slane %v1696_v61, 3  ;;  %v1734_v2 = vrot.slane %v1696_v61, 4 }
 0x27f   :  { %v1700_v7 = vmul.f32 %v1698_v50, %v2132_v35 }
 0x281   :  { %v1702_v43 = vrot.slane %v1700_v7, 6 }
 0x283   :  { %v1704_v21 = vsub.f32 %v2165_v1, %v1702_v43 }
 0x285   :  { %v1711_v45 = vsub.f32 %v1704_v21, %v1709_v49 }
 0x287   :  { %v1718_v25 = vsub.f32 %v1711_v45, %v1716_v51 }
 0x289   :  { %v1722_v57 = vsub.f32 %v1718_v25, %v1721_v38 }
 0x28b   :  { %v1729_v60 = vsub.f32 %v1722_v57, %v1727_v59 }
 0x28d   :  { %v1730_v35 = vmul.f32 %v1729_v60, %v2129_v30 }
 0x28f   :  { %v1732_v33 = vrot.slane %v1730_v35, 4 }
 0x291   :  { %v1741_v1 = vsel %vm1740_vm9, %v2250_v56, %v1732_v33 }
 0x292   :  { %v1743_v54 = vsel %vm1742_vm10, %v1741_v1, %v1734_v2 }
 0x293   :  { %v1744_v31 = vsel %vm1017_vm15, %v1743_v54, %v1736_v52 }
 0x294   :  { %v1746_v6 = vsel %vm1745_vm11, %v1744_v31, %v1738_v63 }
 0x295   :  { %1754 = vst.msk [vmem:[%s2355_s5 + $0x20] sm:$0xff] %vm1749_vm2, %v1746_v6 }

</bundles_post_ra>
